<compile_context>
chip_gen: v7x
topology: tpu7x:2x2x1
jax: 0.10.0
libtpu: 0.0.40
codegen_flags: <defaults>
</compile_context>

<pallas_src>
import functools
import math

import jax
import jax.numpy as jnp
from jax.experimental import pallas as pl
from jax.experimental.pallas import tpu as pltpu

# MXU operand dtype. bf16 halves streamed-weight DMA (the dominant cost of the
# serial per-layer loop at inference batch sizes) and doubles MXU rate on
# v6e/v7x; accumulation is f32 via preferred_element_type.
_MM_DTYPE = jnp.bfloat16
# TODO(synk): per-generation weight quantization (int8 on v5e/v6e, fp8 on v7x)
# would shrink the streamed-weight DMA further; not portable in one script, so
# bf16 streaming is used everywhere here.

_HEAD_SIZES = (36, 36, 20)                     # fc_dirx / fc_diry / fc_intens
_HEAD_TOTAL = sum(_HEAD_SIZES)                 # 92
_HEAD_PAD = ((_HEAD_TOTAL + 127) // 128) * 128  # lane-dense output width (128)


# ----------------------------- in-kernel helpers -----------------------------

def _layernorm(x, w, b, eps=1e-5):
    mu = jnp.mean(x, axis=-1, keepdims=True)
    var = jnp.mean((x - mu) ** 2, axis=-1, keepdims=True)
    return (x - mu) * jax.lax.rsqrt(var + eps) * w + b


def _gelu_exact(x):
    # matches torch.nn.functional.gelu (erf form)
    return 0.5 * x * (1.0 + jax.lax.erf(x * (1.0 / math.sqrt(2.0))))


def _mm(a, b):
    # cast ONLY the MXU operands; accumulate in f32
    return jnp.dot(a.astype(_MM_DTYPE), b.astype(_MM_DTYPE),
                   preferred_element_type=jnp.float32)


# ----------------------------- fused network kernel --------------------------

def _fused_kernel(x_ref, pos_ref,
                  ln0w_ref, ln0b_ref, qkvw_ref, projw_ref, projb_ref,
                  ln1w_ref, ln1b_ref, fc1w_ref, fc1b_ref, fc2w_ref, fc2b_ref,
                  normw_ref, normb_ref, poolw_ref, poolb_ref, headw_ref, headb_ref,
                  out_ref, act_ref, *, num_heads):
    layer = pl.program_id(0)
    B, S, D = x_ref.shape
    N = B * S
    hd = D // num_heads
    scale = hd ** -0.5

    # ---- first grid step: bring activation into residence (fuse pos-emb add) ----
    @pl.when(layer == 0)
    def _init():
        act_ref[...] = (x_ref[...] + pos_ref[...]).reshape(N, D)

    x = act_ref[...]                                             # (B*S, D), resident f32

    # ---- multi-head self-attention (pre-norm) ----
    xn = _layernorm(x, ln0w_ref[0], ln0b_ref[0])                 # f32
    qkv = _mm(xn, qkvw_ref[0]).reshape(B, S, 3 * D)              # f32 accum; leading-dim reshape only

    # Per-head attention with single-batch-dim einsums (no axis-0 split/merge
    # concatenates; score scratch bounded to O(B*S^2) per head).
    # TODO(synk): for long sequences, block over KV tiles (flash-style online
    # softmax) instead of materializing the full (B, S, S) scores per head.
    head_out = []
    for h in range(num_heads):
        q = qkv[:, :, h * hd:(h + 1) * hd]                       # (B, S, hd)
        k = qkv[:, :, D + h * hd:D + (h + 1) * hd]
        v = qkv[:, :, 2 * D + h * hd:2 * D + (h + 1) * hd]
        s = jnp.einsum('bqd,bkd->bqk', q.astype(_MM_DTYPE), k.astype(_MM_DTYPE),
                       preferred_element_type=jnp.float32) * scale
        s = s - jnp.max(s, axis=-1, keepdims=True)               # f32 softmax (VPU/EUP)
        p = jnp.exp(s)
        p = p * pl.reciprocal(jnp.sum(p, axis=-1, keepdims=True), approx=True)
        head_out.append(
            jnp.einsum('bqk,bkd->bqd', p.astype(_MM_DTYPE), v.astype(_MM_DTYPE),
                       preferred_element_type=jnp.float32))      # (B, S, hd)
    attn = jnp.concatenate(head_out, axis=-1).reshape(N, D)      # (B*S, D)

    y = _mm(attn, projw_ref[0]) + projb_ref[0]
    x1 = x + y                                                   # residual 1
    x2 = _layernorm(x1, ln1w_ref[0], ln1b_ref[0])                # norm1
    h1 = _gelu_exact(_mm(x2, fc1w_ref[0]) + fc1b_ref[0])
    y2 = _mm(h1, fc2w_ref[0]) + fc2b_ref[0]
    # NOTE: residual-2 base is the *post-LayerNorm* x2 (CCT / LCViTNet block
    # ordering: x = norm1(x + attn); x = x + mlp(x)). Do not "fix" to pre-norm.
    new_x = x2 + y2
    act_ref[...] = new_x

    # ---- classifier head, fused into the last grid step ----
    @pl.when(layer == pl.num_programs(0) - 1)
    def _head():
        xn3 = _layernorm(new_x, normw_ref[...], normb_ref[...]).reshape(B, S, D)
        # seq-pool logits: VPU reduction instead of an (S,D)x(D,1) MXU pass
        logits = jnp.sum(xn3 * poolw_ref[...], axis=-1, keepdims=True) + poolb_ref[...]
        logits = logits - jnp.max(logits, axis=1, keepdims=True)
        w = jnp.exp(logits)
        w = w * pl.reciprocal(jnp.sum(w, axis=1, keepdims=True), approx=True)
        pooled = jnp.sum(w * xn3, axis=1)                        # (B, D) f32
        # three heads packed into one lane-dense (D, 128) matmul + 128-lane store
        out_ref[...] = _mm(pooled, headw_ref[...]) + headb_ref[...]


# ----------------------------- wrapper ----------------------------------------

def _pack_heads(head, dim):
    """Concatenate fc_dirx / fc_diry / fc_intens into one lane-dense matmul."""
    w = jnp.zeros((dim, _HEAD_PAD), jnp.float32)
    b = jnp.zeros((1, _HEAD_PAD), jnp.float32)
    off = 0
    for wk, bk, n in (('fcx_w', 'fcx_b', 36), ('fcy_w', 'fcy_b', 36),
                      ('fci_w', 'fci_b', 20)):
        w = w.at[:, off:off + n].set(head[wk])
        b = b.at[0, off:off + n].set(head[bk])
        off += n
    return w, b


@functools.partial(jax.jit, static_argnames=('num_heads',))
def transformer_classifier(x, pos_emb, blocks, head, *, num_heads):
    B, S, D = x.shape
    L = blocks['qkv_w'].shape[0]
    F = blocks['fc1_w'].shape[-1]
    head_w, head_b = _pack_heads(head, D)

    wt = lambda a: a.astype(_MM_DTYPE)            # one-time cast, outside the kernel

    per_layer = lambda l: (l, 0, 0)
    const2 = lambda l: (0, 0)
    const3 = lambda l: (0, 0, 0)
    once = pl.Buffered(1)                         # constant-index inputs: 1 buffer

    grid_spec = pltpu.PrefetchScalarGridSpec(
        num_scalar_prefetch=0,
        grid=(L,),
        in_specs=[
            pl.BlockSpec((B, S, D), const3, pipeline_mode=once),     # x
            pl.BlockSpec((1, S, D), const3, pipeline_mode=once),     # positional embedding
            pl.BlockSpec((1, 1, D), per_layer),         # pre_norm weight   (f32)
            pl.BlockSpec((1, 1, D), per_layer),         # pre_norm bias     (f32)
            pl.BlockSpec((1, D, 3 * D), per_layer),     # qkv weight        (bf16)
            pl.BlockSpec((1, D, D), per_layer),         # proj weight       (bf16)
            pl.BlockSpec((1, 1, D), per_layer),         # proj bias         (f32)
            pl.BlockSpec((1, 1, D), per_layer),         # norm1 weight      (f32)
            pl.BlockSpec((1, 1, D), per_layer),         # norm1 bias        (f32)
            pl.BlockSpec((1, D, F), per_layer),         # fc1 weight        (bf16)
            pl.BlockSpec((1, 1, F), per_layer),         # fc1 bias          (f32)
            pl.BlockSpec((1, F, D), per_layer),         # fc2 weight        (bf16)
            pl.BlockSpec((1, 1, D), per_layer),         # fc2 bias          (f32)
            pl.BlockSpec((1, D), const2, pipeline_mode=once),        # final norm weight
            pl.BlockSpec((1, D), const2, pipeline_mode=once),        # final norm bias
            pl.BlockSpec((1, D), const2, pipeline_mode=once),        # attention_pool weight
            pl.BlockSpec((1, 1), const2, pipeline_mode=once),        # attention_pool bias
            pl.BlockSpec((D, _HEAD_PAD), const2, pipeline_mode=once),  # packed head w (bf16)
            pl.BlockSpec((1, _HEAD_PAD), const2, pipeline_mode=once),  # packed head b
        ],
        out_specs=pl.BlockSpec((B, _HEAD_PAD), const2),
        scratch_shapes=[pltpu.VMEM((B * S, D), jnp.float32)],   # resident activation
    )
    # TODO(synk): on v7x, add a leading "parallel" batch grid axis (B split over
    # the 2 TensorCores) once the kernel is compute-bound rather than
    # weight-DMA bound.
    out = pl.pallas_call(
        functools.partial(_fused_kernel, num_heads=num_heads),
        out_shape=jax.ShapeDtypeStruct((B, _HEAD_PAD), jnp.float32),
        grid_spec=grid_spec,
        compiler_params=pltpu.CompilerParams(
            dimension_semantics=("arbitrary",),        # layers are sequential
            # 48 MiB: above the 16/32 MiB scoped defaults on v5e/v6e (keeps the
            # double-buffered bf16 qkv/fc1/fc2 tiles whole at large D/F) while
            # staying under v7x's 64 MiB physical VMEM.
            vmem_limit_bytes=48 * 1024 * 1024,
        ),
    )(x, pos_emb,
      blocks['ln0_w'], blocks['ln0_b'], wt(blocks['qkv_w']),
      wt(blocks['proj_w']), blocks['proj_b'],
      blocks['ln1_w'], blocks['ln1_b'],
      wt(blocks['fc1_w']), blocks['fc1_b'], wt(blocks['fc2_w']), blocks['fc2_b'],
      head['norm_w'], head['norm_b'], head['pool_w'], head['pool_b'],
      wt(head_w), head_b)
    o1, o2 = _HEAD_SIZES[0], _HEAD_SIZES[0] + _HEAD_SIZES[1]
    return out[:, :o1], out[:, o1:o2], out[:, o2:_HEAD_TOTAL]


# ----------------------------- model glue / params ---------------------------

def sinusoidal_embedding(n_channels, dim):
    p = jnp.arange(n_channels, dtype=jnp.float32)[:, None]
    i = jnp.arange(dim, dtype=jnp.float32)[None, :]
    pe = p / jnp.power(10000.0, 2.0 * jnp.floor(i / 2.0) / dim)
    pe = jnp.where((jnp.arange(dim) % 2 == 0)[None, :], jnp.sin(pe), jnp.cos(pe))
    return pe[None]                                              # (1, S, D)


def init_params(key, num_layers, dim, mlp_ratio):
    ff = int(dim * mlp_ratio)
    kit = iter(jax.random.split(key, 4 * num_layers + 8))

    def tn(shape, std=0.02):        # trunc_normal_(std=0.02)
        return jax.random.truncated_normal(next(kit), -2.0, 2.0, shape,
                                           jnp.float32) * std

    L = num_layers
    blocks = dict(
        ln0_w=jnp.ones((L, 1, dim), jnp.float32),
        ln0_b=jnp.zeros((L, 1, dim), jnp.float32),
        qkv_w=tn((L, dim, 3 * dim)),
        proj_w=tn((L, dim, dim)),
        proj_b=jnp.zeros((L, 1, dim), jnp.float32),
        ln1_w=jnp.ones((L, 1, dim), jnp.float32),
        ln1_b=jnp.zeros((L, 1, dim), jnp.float32),
        fc1_w=tn((L, dim, ff)),
        fc1_b=jnp.zeros((L, 1, ff), jnp.float32),
        fc2_w=tn((L, ff, dim)),
        fc2_b=jnp.zeros((L, 1, dim), jnp.float32),
    )
    head = dict(
        norm_w=jnp.ones((1, dim), jnp.float32),
        norm_b=jnp.zeros((1, dim), jnp.float32),
        pool_w=tn((1, dim)),                    # nn.Linear(dim, 1).weight layout
        pool_b=jnp.zeros((1, 1), jnp.float32),
        fcx_w=tn((dim, 36)), fcx_b=jnp.zeros((36,), jnp.float32),
        fcy_w=tn((dim, 36)), fcy_b=jnp.zeros((36,), jnp.float32),
        fci_w=tn((dim, 20)), fci_b=jnp.zeros((20,), jnp.float32),
    )
    return blocks, head


# ----------------------------- pure-JAX reference ----------------------------

def _ref_forward(x, pos_emb, blocks, head, num_heads):
    def ln(v, w, b, eps=1e-5):
        mu = v.mean(-1, keepdims=True)
        var = ((v - mu) ** 2).mean(-1, keepdims=True)
        return (v - mu) / jnp.sqrt(var + eps) * w + b

    x = x + pos_emb
    B, S, D = x.shape
    H = num_heads
    hd = D // H
    L = blocks['qkv_w'].shape[0]
    for l in range(L):
        xn = ln(x, blocks['ln0_w'][l, 0], blocks['ln0_b'][l, 0])
        qkv = xn @ blocks['qkv_w'][l]
        q = qkv[..., :D].reshape(B, S, H, hd)
        k = qkv[..., D:2 * D].reshape(B, S, H, hd)
        v = qkv[..., 2 * D:].reshape(B, S, H, hd)
        s = jnp.einsum('bqhd,bkhd->bhqk', q, k) * hd ** -0.5
        a = jax.nn.softmax(s, axis=-1)
        o = jnp.einsum('bhqk,bkhd->bqhd', a, v).reshape(B, S, D)
        x = x + (o @ blocks['proj_w'][l] + blocks['proj_b'][l, 0])
        x = ln(x, blocks['ln1_w'][l], blocks['ln1_b'][l, 0])
        hmid = jax.nn.gelu(x @ blocks['fc1_w'][l] + blocks['fc1_b'][l, 0],
                           approximate=False)
        x = x + (hmid @ blocks['fc2_w'][l] + blocks['fc2_b'][l, 0])
    x = ln(x, head['norm_w'][0], head['norm_b'][0])
    logits = jnp.einsum('bsd,d->bs', x, head['pool_w'][0]) + head['pool_b'][0, 0]
    w = jax.nn.softmax(logits, axis=1)
    pooled = jnp.einsum('bs,bsd->bd', w, x)
    return (pooled @ head['fcx_w'] + head['fcx_b'],
            pooled @ head['fcy_w'] + head['fcy_b'],
            pooled @ head['fci_w'] + head['fci_b'])


# ----------------------------------- main -------------------------------------

if __name__ == "__main__":
    B, S, D, H, L, MLP = 2, 8, 32, 4, 2, 4.0
    key = jax.random.PRNGKey(0)
    kx, kp = jax.random.split(key)

    x = jax.random.normal(kx, (B, S, D), jnp.float32)
    blocks, head = init_params(kp, L, D, MLP)
    pos_emb = sinusoidal_embedding(S, D)

    out_x, out_y, out_ints = transformer_classifier(x, pos_emb, blocks, head,
                                                    num_heads=H)
    jax.block_until_ready((out_x, out_y, out_ints))

    ref_x, ref_y, ref_i = _ref_forward(x, pos_emb, blocks, head, H)
    assert out_x.shape == (B, 36) and out_y.shape == (B, 36) and out_ints.shape == (B, 20)
    # bf16 MXU operands + approx-reciprocal softmax vs f32 reference => ~1e-2 parity
    assert jnp.allclose(out_x, ref_x, atol=2e-2, rtol=2e-2)
    assert jnp.allclose(out_y, ref_y, atol=2e-2, rtol=2e-2)
    assert jnp.allclose(out_ints, ref_i, atol=2e-2, rtol=2e-2)

    print("KERNEL_OK")
</pallas_src>

<mosaic_0001>
module attributes {stable_mosaic.version = 11 : i64} {
  func.func @_fused_kernel(%arg0: i32, %arg1: memref<2x8x32xf32, #tpu.memory_space<vmem>>, %arg2: memref<1x8x32xf32, #tpu.memory_space<vmem>>, %arg3: memref<1x1x32xf32, #tpu.memory_space<vmem>>, %arg4: memref<1x1x32xf32, #tpu.memory_space<vmem>>, %arg5: memref<1x32x96xbf16, #tpu.memory_space<vmem>>, %arg6: memref<1x32x32xbf16, #tpu.memory_space<vmem>>, %arg7: memref<1x1x32xf32, #tpu.memory_space<vmem>>, %arg8: memref<1x1x32xf32, #tpu.memory_space<vmem>>, %arg9: memref<1x1x32xf32, #tpu.memory_space<vmem>>, %arg10: memref<1x32x128xbf16, #tpu.memory_space<vmem>>, %arg11: memref<1x1x128xf32, #tpu.memory_space<vmem>>, %arg12: memref<1x128x32xbf16, #tpu.memory_space<vmem>>, %arg13: memref<1x1x32xf32, #tpu.memory_space<vmem>>, %arg14: memref<1x32xf32, #tpu.memory_space<vmem>>, %arg15: memref<1x32xf32, #tpu.memory_space<vmem>>, %arg16: memref<1x32xf32, #tpu.memory_space<vmem>>, %arg17: memref<1x1xf32, #tpu.memory_space<vmem>>, %arg18: memref<32x128xbf16, #tpu.memory_space<vmem>>, %arg19: memref<1x128xf32, #tpu.memory_space<vmem>>, %arg20: memref<2x128xf32, #tpu.memory_space<vmem>>, %arg21: memref<16x32xf32, #tpu.memory_space<vmem>>) attributes {dimension_semantics = [#tpu.dimension_semantics<arbitrary>], iteration_bounds = array<i64: 2>, scalar_prefetch = 0 : i64, scratch_operands = 1 : i64, tpu.core_type = #tpu.core_type<tc>, window_params = [{pipeline_mode = #tpu.pipeline_mode<synchronous>, transform_indices = @transform_0, window_bounds = array<i64: 2, 8, 32>}, {pipeline_mode = #tpu.pipeline_mode<synchronous>, transform_indices = @transform_1, window_bounds = array<i64: 1, 8, 32>}, {transform_indices = @transform_2, window_bounds = array<i64: 1, 1, 32>}, {transform_indices = @transform_3, window_bounds = array<i64: 1, 1, 32>}, {transform_indices = @transform_4, window_bounds = array<i64: 1, 32, 96>}, {transform_indices = @transform_5, window_bounds = array<i64: 1, 32, 32>}, {transform_indices = @transform_6, window_bounds = array<i64: 1, 1, 32>}, {transform_indices = @transform_7, window_bounds = array<i64: 1, 1, 32>}, {transform_indices = @transform_8, window_bounds = array<i64: 1, 1, 32>}, {transform_indices = @transform_9, window_bounds = array<i64: 1, 32, 128>}, {transform_indices = @transform_10, window_bounds = array<i64: 1, 1, 128>}, {transform_indices = @transform_11, window_bounds = array<i64: 1, 128, 32>}, {transform_indices = @transform_12, window_bounds = array<i64: 1, 1, 32>}, {pipeline_mode = #tpu.pipeline_mode<synchronous>, transform_indices = @transform_13, window_bounds = array<i64: 1, 32>}, {pipeline_mode = #tpu.pipeline_mode<synchronous>, transform_indices = @transform_14, window_bounds = array<i64: 1, 32>}, {pipeline_mode = #tpu.pipeline_mode<synchronous>, transform_indices = @transform_15, window_bounds = array<i64: 1, 32>}, {pipeline_mode = #tpu.pipeline_mode<synchronous>, transform_indices = @transform_16, window_bounds = array<i64: 1, 1>}, {pipeline_mode = #tpu.pipeline_mode<synchronous>, transform_indices = @transform_17, window_bounds = array<i64: 32, 128>}, {pipeline_mode = #tpu.pipeline_mode<synchronous>, transform_indices = @transform_18, window_bounds = array<i64: 1, 128>}, {pipeline_mode = #tpu.pipeline_mode<synchronous>, transform_indices = @transform_19, window_bounds = array<i64: 2, 128>}]} {
    %c0_i32 = arith.constant 0 : i32
    %0 = arith.cmpi eq, %arg0, %c0_i32 : i32
    %1 = arith.extui %0 : i1 to i32
    %c0_i32_0 = arith.constant 0 : i32
    %2 = arith.cmpi ne, %1, %c0_i32_0 : i32
    scf.if %2 {
      %c0_74 = arith.constant 0 : index
      %c0_75 = arith.constant 0 : index
      %c0_76 = arith.constant 0 : index
      %185 = vector.load %arg1[%c0_74, %c0_75, %c0_76] : memref<2x8x32xf32, #tpu.memory_space<vmem>>, vector<2x8x32xf32>
      %c0_77 = arith.constant 0 : index
      %c0_78 = arith.constant 0 : index
      %c0_79 = arith.constant 0 : index
      %186 = vector.load %arg2[%c0_77, %c0_78, %c0_79] : memref<1x8x32xf32, #tpu.memory_space<vmem>>, vector<1x8x32xf32>
      %187 = vector.broadcast %186 : vector<1x8x32xf32> to vector<2x8x32xf32>
      %188 = arith.addf %185, %187 : vector<2x8x32xf32>
      %189 = vector.shape_cast %188 : vector<2x8x32xf32> to vector<16x32xf32>
      %c0_80 = arith.constant 0 : index
      %c0_81 = arith.constant 0 : index
      %190 = vector.load %arg21[%c0_80, %c0_81] : memref<16x32xf32, #tpu.memory_space<vmem>>, vector<16x32xf32>
      tpu.vector_store %arg21[%c0_80, %c0_81], %189 {strides = array<i32>} : memref<16x32xf32, #tpu.memory_space<vmem>>, vector<16x32xf32>,
    } else {
    }
    %c0 = arith.constant 0 : index
    %c0_1 = arith.constant 0 : index
    %3 = vector.load %arg21[%c0, %c0_1] : memref<16x32xf32, #tpu.memory_space<vmem>>, vector<16x32xf32>
    %c0_2 = arith.constant 0 : index
    %c0_3 = arith.constant 0 : index
    %c0_4 = arith.constant 0 : index
    %4 = vector.load %arg3[%c0_2, %c0_3, %c0_4] : memref<1x1x32xf32, #tpu.memory_space<vmem>>, vector<1x1x32xf32>
    %5 = vector.shape_cast %4 : vector<1x1x32xf32> to vector<1x32xf32>
    %c0_5 = arith.constant 0 : index
    %c0_6 = arith.constant 0 : index
    %c0_7 = arith.constant 0 : index
    %6 = vector.load %arg4[%c0_5, %c0_6, %c0_7] : memref<1x1x32xf32, #tpu.memory_space<vmem>>, vector<1x1x32xf32>
    %7 = vector.shape_cast %6 : vector<1x1x32xf32> to vector<1x32xf32>
    %cst = arith.constant dense<0.000000e+00> : vector<16xf32>
    %8 = vector.multi_reduction <add>, %3, %cst [1] : vector<16x32xf32> to vector<16xf32>
    %9 = vector.shape_cast %8 : vector<16xf32> to vector<16x1xf32>
    %cst_8 = arith.constant 3.200000e+01 : f32
    %10 = vector.broadcast %cst_8 : f32 to vector<16x1xf32>
    %11 = arith.divf %9, %10 : vector<16x1xf32>
    %12 = vector.broadcast %11 : vector<16x1xf32> to vector<16x32xf32>
    %13 = arith.subf %3, %12 : vector<16x32xf32>
    %14 = arith.mulf %13, %13 : vector<16x32xf32>
    %cst_9 = arith.constant dense<0.000000e+00> : vector<16xf32>
    %15 = vector.multi_reduction <add>, %14, %cst_9 [1] : vector<16x32xf32> to vector<16xf32>
    %16 = vector.shape_cast %15 : vector<16xf32> to vector<16x1xf32>
    %cst_10 = arith.constant 3.200000e+01 : f32
    %17 = vector.broadcast %cst_10 : f32 to vector<16x1xf32>
    %18 = arith.divf %16, %17 : vector<16x1xf32>
    %19 = vector.broadcast %11 : vector<16x1xf32> to vector<16x32xf32>
    %20 = arith.subf %3, %19 : vector<16x32xf32>
    %cst_11 = arith.constant 9.99999974E-6 : f32
    %21 = vector.broadcast %cst_11 : f32 to vector<16x1xf32>
    %22 = arith.addf %18, %21 : vector<16x1xf32>
    %23 = math.rsqrt %22 : vector<16x1xf32>
    %24 = vector.broadcast %23 : vector<16x1xf32> to vector<16x32xf32>
    %25 = arith.mulf %20, %24 : vector<16x32xf32>
    %26 = vector.broadcast %5 : vector<1x32xf32> to vector<16x32xf32>
    %27 = arith.mulf %25, %26 : vector<16x32xf32>
    %28 = vector.broadcast %7 : vector<1x32xf32> to vector<16x32xf32>
    %29 = arith.addf %27, %28 : vector<16x32xf32>
    %c0_12 = arith.constant 0 : index
    %c0_13 = arith.constant 0 : index
    %c0_14 = arith.constant 0 : index
    %30 = vector.load %arg5[%c0_12, %c0_13, %c0_14] : memref<1x32x96xbf16, #tpu.memory_space<vmem>>, vector<1x32x96xbf16>
    %31 = vector.shape_cast %30 : vector<1x32x96xbf16> to vector<32x96xbf16>
    %32 = arith.truncf %29 : vector<16x32xf32> to vector<16x32xbf16>
    %cst_15 = arith.constant dense<0.000000e+00> : vector<16x96xf32>
    %33 = tpu.matmul %32, %31, %cst_15 {dimension_numbers = #tpu.dot_dimension_numbers<[1], [0], [0], [1], [0, 0, 1, 1], [], []>} : vector<16x32xbf16>, vector<32x96xbf16>, vector<16x96xf32> -> vector<16x96xf32>
    %34 = vector.shape_cast %33 : vector<16x96xf32> to vector<2x8x96xf32>
    %35 = vector.extract_strided_slice %34 {offsets = [0, 0, 0], sizes = [2, 8, 8], strides = [1, 1, 1]} : vector<2x8x96xf32> to vector<2x8x8xf32>
    %36 = vector.extract_strided_slice %34 {offsets = [0, 0, 32], sizes = [2, 8, 8], strides = [1, 1, 1]} : vector<2x8x96xf32> to vector<2x8x8xf32>
    %37 = vector.extract_strided_slice %34 {offsets = [0, 0, 64], sizes = [2, 8, 8], strides = [1, 1, 1]} : vector<2x8x96xf32> to vector<2x8x8xf32>
    %38 = arith.truncf %35 : vector<2x8x8xf32> to vector<2x8x8xbf16>
    %39 = arith.truncf %36 : vector<2x8x8xf32> to vector<2x8x8xbf16>
    "tpu.trace_start"() <{level = 10 : i32, message = "bqd,bkd->bqk"}> : () -> ()
    %cst_16 = arith.constant dense<0.000000e+00> : vector<2x8x8xf32>
    %40 = tpu.matmul %38, %39, %cst_16 {dimension_numbers = #tpu.dot_dimension_numbers<[2], [2], [1], [1], [0, 0, 0, 1, 1, 1], [0], [0]>} : vector<2x8x8xbf16>, vector<2x8x8xbf16>, vector<2x8x8xf32> -> vector<2x8x8xf32>
    "tpu.trace_stop"() : () -> ()
    %cst_17 = arith.constant 0.353553385 : f32
    %41 = vector.broadcast %cst_17 : f32 to vector<2x8x8xf32>
    %42 = arith.mulf %40, %41 : vector<2x8x8xf32>
    %cst_18 = arith.constant dense<0xFF800000> : vector<2x8xf32>
    %43 = vector.multi_reduction <maximumf>, %42, %cst_18 [2] : vector<2x8x8xf32> to vector<2x8xf32>
    %44 = vector.shape_cast %43 : vector<2x8xf32> to vector<2x8x1xf32>
    %45 = vector.broadcast %44 : vector<2x8x1xf32> to vector<2x8x8xf32>
    %46 = arith.subf %42, %45 : vector<2x8x8xf32>
    %47 = math.exp %46 : vector<2x8x8xf32>
    %cst_19 = arith.constant dense<0.000000e+00> : vector<2x8xf32>
    %48 = vector.multi_reduction <add>, %47, %cst_19 [2] : vector<2x8x8xf32> to vector<2x8xf32>
    %49 = vector.shape_cast %48 : vector<2x8xf32> to vector<2x8x1xf32>
    %50 = tpu.reciprocal %49 {approx = true} : vector<2x8x1xf32> -> vector<2x8x1xf32>
    %51 = vector.broadcast %50 : vector<2x8x1xf32> to vector<2x8x8xf32>
    %52 = arith.mulf %47, %51 : vector<2x8x8xf32>
    %53 = arith.truncf %52 : vector<2x8x8xf32> to vector<2x8x8xbf16>
    %54 = arith.truncf %37 : vector<2x8x8xf32> to vector<2x8x8xbf16>
    "tpu.trace_start"() <{level = 10 : i32, message = "bqk,bkd->bqd"}> : () -> ()
    %cst_20 = arith.constant dense<0.000000e+00> : vector<2x8x8xf32>
    %55 = tpu.matmul %53, %54, %cst_20 {dimension_numbers = #tpu.dot_dimension_numbers<[2], [1], [1], [2], [0, 0, 0, 1, 1, 2], [0], [0]>} : vector<2x8x8xbf16>, vector<2x8x8xbf16>, vector<2x8x8xf32> -> vector<2x8x8xf32>
    "tpu.trace_stop"() : () -> ()
    %56 = vector.extract_strided_slice %34 {offsets = [0, 0, 8], sizes = [2, 8, 8], strides = [1, 1, 1]} : vector<2x8x96xf32> to vector<2x8x8xf32>
    %57 = vector.extract_strided_slice %34 {offsets = [0, 0, 40], sizes = [2, 8, 8], strides = [1, 1, 1]} : vector<2x8x96xf32> to vector<2x8x8xf32>
    %58 = vector.extract_strided_slice %34 {offsets = [0, 0, 72], sizes = [2, 8, 8], strides = [1, 1, 1]} : vector<2x8x96xf32> to vector<2x8x8xf32>
    %59 = arith.truncf %56 : vector<2x8x8xf32> to vector<2x8x8xbf16>
    %60 = arith.truncf %57 : vector<2x8x8xf32> to vector<2x8x8xbf16>
    "tpu.trace_start"() <{level = 10 : i32, message = "bqd,bkd->bqk"}> : () -> ()
    %cst_21 = arith.constant dense<0.000000e+00> : vector<2x8x8xf32>
    %61 = tpu.matmul %59, %60, %cst_21 {dimension_numbers = #tpu.dot_dimension_numbers<[2], [2], [1], [1], [0, 0, 0, 1, 1, 1], [0], [0]>} : vector<2x8x8xbf16>, vector<2x8x8xbf16>, vector<2x8x8xf32> -> vector<2x8x8xf32>
    "tpu.trace_stop"() : () -> ()
    %cst_22 = arith.constant 0.353553385 : f32
    %62 = vector.broadcast %cst_22 : f32 to vector<2x8x8xf32>
    %63 = arith.mulf %61, %62 : vector<2x8x8xf32>
    %cst_23 = arith.constant dense<0xFF800000> : vector<2x8xf32>
    %64 = vector.multi_reduction <maximumf>, %63, %cst_23 [2] : vector<2x8x8xf32> to vector<2x8xf32>
    %65 = vector.shape_cast %64 : vector<2x8xf32> to vector<2x8x1xf32>
    %66 = vector.broadcast %65 : vector<2x8x1xf32> to vector<2x8x8xf32>
    %67 = arith.subf %63, %66 : vector<2x8x8xf32>
    %68 = math.exp %67 : vector<2x8x8xf32>
    %cst_24 = arith.constant dense<0.000000e+00> : vector<2x8xf32>
    %69 = vector.multi_reduction <add>, %68, %cst_24 [2] : vector<2x8x8xf32> to vector<2x8xf32>
    %70 = vector.shape_cast %69 : vector<2x8xf32> to vector<2x8x1xf32>
    %71 = tpu.reciprocal %70 {approx = true} : vector<2x8x1xf32> -> vector<2x8x1xf32>
    %72 = vector.broadcast %71 : vector<2x8x1xf32> to vector<2x8x8xf32>
    %73 = arith.mulf %68, %72 : vector<2x8x8xf32>
    %74 = arith.truncf %73 : vector<2x8x8xf32> to vector<2x8x8xbf16>
    %75 = arith.truncf %58 : vector<2x8x8xf32> to vector<2x8x8xbf16>
    "tpu.trace_start"() <{level = 10 : i32, message = "bqk,bkd->bqd"}> : () -> ()
    %cst_25 = arith.constant dense<0.000000e+00> : vector<2x8x8xf32>
    %76 = tpu.matmul %74, %75, %cst_25 {dimension_numbers = #tpu.dot_dimension_numbers<[2], [1], [1], [2], [0, 0, 0, 1, 1, 2], [0], [0]>} : vector<2x8x8xbf16>, vector<2x8x8xbf16>, vector<2x8x8xf32> -> vector<2x8x8xf32>
    "tpu.trace_stop"() : () -> ()
    %77 = vector.extract_strided_slice %34 {offsets = [0, 0, 16], sizes = [2, 8, 8], strides = [1, 1, 1]} : vector<2x8x96xf32> to vector<2x8x8xf32>
    %78 = vector.extract_strided_slice %34 {offsets = [0, 0, 48], sizes = [2, 8, 8], strides = [1, 1, 1]} : vector<2x8x96xf32> to vector<2x8x8xf32>
    %79 = vector.extract_strided_slice %34 {offsets = [0, 0, 80], sizes = [2, 8, 8], strides = [1, 1, 1]} : vector<2x8x96xf32> to vector<2x8x8xf32>
    %80 = arith.truncf %77 : vector<2x8x8xf32> to vector<2x8x8xbf16>
    %81 = arith.truncf %78 : vector<2x8x8xf32> to vector<2x8x8xbf16>
    "tpu.trace_start"() <{level = 10 : i32, message = "bqd,bkd->bqk"}> : () -> ()
    %cst_26 = arith.constant dense<0.000000e+00> : vector<2x8x8xf32>
    %82 = tpu.matmul %80, %81, %cst_26 {dimension_numbers = #tpu.dot_dimension_numbers<[2], [2], [1], [1], [0, 0, 0, 1, 1, 1], [0], [0]>} : vector<2x8x8xbf16>, vector<2x8x8xbf16>, vector<2x8x8xf32> -> vector<2x8x8xf32>
    "tpu.trace_stop"() : () -> ()
    %cst_27 = arith.constant 0.353553385 : f32
    %83 = vector.broadcast %cst_27 : f32 to vector<2x8x8xf32>
    %84 = arith.mulf %82, %83 : vector<2x8x8xf32>
    %cst_28 = arith.constant dense<0xFF800000> : vector<2x8xf32>
    %85 = vector.multi_reduction <maximumf>, %84, %cst_28 [2] : vector<2x8x8xf32> to vector<2x8xf32>
    %86 = vector.shape_cast %85 : vector<2x8xf32> to vector<2x8x1xf32>
    %87 = vector.broadcast %86 : vector<2x8x1xf32> to vector<2x8x8xf32>
    %88 = arith.subf %84, %87 : vector<2x8x8xf32>
    %89 = math.exp %88 : vector<2x8x8xf32>
    %cst_29 = arith.constant dense<0.000000e+00> : vector<2x8xf32>
    %90 = vector.multi_reduction <add>, %89, %cst_29 [2] : vector<2x8x8xf32> to vector<2x8xf32>
    %91 = vector.shape_cast %90 : vector<2x8xf32> to vector<2x8x1xf32>
    %92 = tpu.reciprocal %91 {approx = true} : vector<2x8x1xf32> -> vector<2x8x1xf32>
    %93 = vector.broadcast %92 : vector<2x8x1xf32> to vector<2x8x8xf32>
    %94 = arith.mulf %89, %93 : vector<2x8x8xf32>
    %95 = arith.truncf %94 : vector<2x8x8xf32> to vector<2x8x8xbf16>
    %96 = arith.truncf %79 : vector<2x8x8xf32> to vector<2x8x8xbf16>
    "tpu.trace_start"() <{level = 10 : i32, message = "bqk,bkd->bqd"}> : () -> ()
    %cst_30 = arith.constant dense<0.000000e+00> : vector<2x8x8xf32>
    %97 = tpu.matmul %95, %96, %cst_30 {dimension_numbers = #tpu.dot_dimension_numbers<[2], [1], [1], [2], [0, 0, 0, 1, 1, 2], [0], [0]>} : vector<2x8x8xbf16>, vector<2x8x8xbf16>, vector<2x8x8xf32> -> vector<2x8x8xf32>
    "tpu.trace_stop"() : () -> ()
    %98 = vector.extract_strided_slice %34 {offsets = [0, 0, 24], sizes = [2, 8, 8], strides = [1, 1, 1]} : vector<2x8x96xf32> to vector<2x8x8xf32>
    %99 = vector.extract_strided_slice %34 {offsets = [0, 0, 56], sizes = [2, 8, 8], strides = [1, 1, 1]} : vector<2x8x96xf32> to vector<2x8x8xf32>
    %100 = vector.extract_strided_slice %34 {offsets = [0, 0, 88], sizes = [2, 8, 8], strides = [1, 1, 1]} : vector<2x8x96xf32> to vector<2x8x8xf32>
    %101 = arith.truncf %98 : vector<2x8x8xf32> to vector<2x8x8xbf16>
    %102 = arith.truncf %99 : vector<2x8x8xf32> to vector<2x8x8xbf16>
    "tpu.trace_start"() <{level = 10 : i32, message = "bqd,bkd->bqk"}> : () -> ()
    %cst_31 = arith.constant dense<0.000000e+00> : vector<2x8x8xf32>
    %103 = tpu.matmul %101, %102, %cst_31 {dimension_numbers = #tpu.dot_dimension_numbers<[2], [2], [1], [1], [0, 0, 0, 1, 1, 1], [0], [0]>} : vector<2x8x8xbf16>, vector<2x8x8xbf16>, vector<2x8x8xf32> -> vector<2x8x8xf32>
    "tpu.trace_stop"() : () -> ()
    %cst_32 = arith.constant 0.353553385 : f32
    %104 = vector.broadcast %cst_32 : f32 to vector<2x8x8xf32>
    %105 = arith.mulf %103, %104 : vector<2x8x8xf32>
    %cst_33 = arith.constant dense<0xFF800000> : vector<2x8xf32>
    %106 = vector.multi_reduction <maximumf>, %105, %cst_33 [2] : vector<2x8x8xf32> to vector<2x8xf32>
    %107 = vector.shape_cast %106 : vector<2x8xf32> to vector<2x8x1xf32>
    %108 = vector.broadcast %107 : vector<2x8x1xf32> to vector<2x8x8xf32>
    %109 = arith.subf %105, %108 : vector<2x8x8xf32>
    %110 = math.exp %109 : vector<2x8x8xf32>
    %cst_34 = arith.constant dense<0.000000e+00> : vector<2x8xf32>
    %111 = vector.multi_reduction <add>, %110, %cst_34 [2] : vector<2x8x8xf32> to vector<2x8xf32>
    %112 = vector.shape_cast %111 : vector<2x8xf32> to vector<2x8x1xf32>
    %113 = tpu.reciprocal %112 {approx = true} : vector<2x8x1xf32> -> vector<2x8x1xf32>
    %114 = vector.broadcast %113 : vector<2x8x1xf32> to vector<2x8x8xf32>
    %115 = arith.mulf %110, %114 : vector<2x8x8xf32>
    %116 = arith.truncf %115 : vector<2x8x8xf32> to vector<2x8x8xbf16>
    %117 = arith.truncf %100 : vector<2x8x8xf32> to vector<2x8x8xbf16>
    "tpu.trace_start"() <{level = 10 : i32, message = "bqk,bkd->bqd"}> : () -> ()
    %cst_35 = arith.constant dense<0.000000e+00> : vector<2x8x8xf32>
    %118 = tpu.matmul %116, %117, %cst_35 {dimension_numbers = #tpu.dot_dimension_numbers<[2], [1], [1], [2], [0, 0, 0, 1, 1, 2], [0], [0]>} : vector<2x8x8xbf16>, vector<2x8x8xbf16>, vector<2x8x8xf32> -> vector<2x8x8xf32>
    "tpu.trace_stop"() : () -> ()
    %119 = tpu.concatenate %55, %76, %97, %118 in 2 : vector<2x8x8xf32>, vector<2x8x8xf32>, vector<2x8x8xf32>, vector<2x8x8xf32> -> vector<2x8x32xf32>
    %120 = vector.shape_cast %119 : vector<2x8x32xf32> to vector<16x32xf32>
    %c0_36 = arith.constant 0 : index
    %c0_37 = arith.constant 0 : index
    %c0_38 = arith.constant 0 : index
    %121 = vector.load %arg6[%c0_36, %c0_37, %c0_38] : memref<1x32x32xbf16, #tpu.memory_space<vmem>>, vector<1x32x32xbf16>
    %122 = vector.shape_cast %121 : vector<1x32x32xbf16> to vector<32x32xbf16>
    %123 = arith.truncf %120 : vector<16x32xf32> to vector<16x32xbf16>
    %cst_39 = arith.constant dense<0.000000e+00> : vector<16x32xf32>
    %124 = tpu.matmul %123, %122, %cst_39 {dimension_numbers = #tpu.dot_dimension_numbers<[1], [0], [0], [1], [0, 0, 1, 1], [], []>} : vector<16x32xbf16>, vector<32x32xbf16>, vector<16x32xf32> -> vector<16x32xf32>
    %c0_40 = arith.constant 0 : index
    %c0_41 = arith.constant 0 : index
    %c0_42 = arith.constant 0 : index
    %125 = vector.load %arg7[%c0_40, %c0_41, %c0_42] : memref<1x1x32xf32, #tpu.memory_space<vmem>>, vector<1x1x32xf32>
    %126 = vector.shape_cast %125 : vector<1x1x32xf32> to vector<1x32xf32>
    %127 = vector.broadcast %126 : vector<1x32xf32> to vector<16x32xf32>
    %128 = arith.addf %124, %127 : vector<16x32xf32>
    %129 = arith.addf %3, %128 : vector<16x32xf32>
    %c0_43 = arith.constant 0 : index
    %c0_44 = arith.constant 0 : index
    %c0_45 = arith.constant 0 : index
    %130 = vector.load %arg8[%c0_43, %c0_44, %c0_45] : memref<1x1x32xf32, #tpu.memory_space<vmem>>, vector<1x1x32xf32>
    %131 = vector.shape_cast %130 : vector<1x1x32xf32> to vector<1x32xf32>
    %c0_46 = arith.constant 0 : index
    %c0_47 = arith.constant 0 : index
    %c0_48 = arith.constant 0 : index
    %132 = vector.load %arg9[%c0_46, %c0_47, %c0_48] : memref<1x1x32xf32, #tpu.memory_space<vmem>>, vector<1x1x32xf32>
    %133 = vector.shape_cast %132 : vector<1x1x32xf32> to vector<1x32xf32>
    %cst_49 = arith.constant dense<0.000000e+00> : vector<16xf32>
    %134 = vector.multi_reduction <add>, %129, %cst_49 [1] : vector<16x32xf32> to vector<16xf32>
    %135 = vector.shape_cast %134 : vector<16xf32> to vector<16x1xf32>
    %cst_50 = arith.constant 3.200000e+01 : f32
    %136 = vector.broadcast %cst_50 : f32 to vector<16x1xf32>
    %137 = arith.divf %135, %136 : vector<16x1xf32>
    %138 = vector.broadcast %137 : vector<16x1xf32> to vector<16x32xf32>
    %139 = arith.subf %129, %138 : vector<16x32xf32>
    %140 = arith.mulf %139, %139 : vector<16x32xf32>
    %cst_51 = arith.constant dense<0.000000e+00> : vector<16xf32>
    %141 = vector.multi_reduction <add>, %140, %cst_51 [1] : vector<16x32xf32> to vector<16xf32>
    %142 = vector.shape_cast %141 : vector<16xf32> to vector<16x1xf32>
    %cst_52 = arith.constant 3.200000e+01 : f32
    %143 = vector.broadcast %cst_52 : f32 to vector<16x1xf32>
    %144 = arith.divf %142, %143 : vector<16x1xf32>
    %145 = vector.broadcast %137 : vector<16x1xf32> to vector<16x32xf32>
    %146 = arith.subf %129, %145 : vector<16x32xf32>
    %cst_53 = arith.constant 9.99999974E-6 : f32
    %147 = vector.broadcast %cst_53 : f32 to vector<16x1xf32>
    %148 = arith.addf %144, %147 : vector<16x1xf32>
    %149 = math.rsqrt %148 : vector<16x1xf32>
    %150 = vector.broadcast %149 : vector<16x1xf32> to vector<16x32xf32>
    %151 = arith.mulf %146, %150 : vector<16x32xf32>
    %152 = vector.broadcast %131 : vector<1x32xf32> to vector<16x32xf32>
    %153 = arith.mulf %151, %152 : vector<16x32xf32>
    %154 = vector.broadcast %133 : vector<1x32xf32> to vector<16x32xf32>
    %155 = arith.addf %153, %154 : vector<16x32xf32>
    %c0_54 = arith.constant 0 : index
    %c0_55 = arith.constant 0 : index
    %c0_56 = arith.constant 0 : index
    %156 = vector.load %arg10[%c0_54, %c0_55, %c0_56] : memref<1x32x128xbf16, #tpu.memory_space<vmem>>, vector<1x32x128xbf16>
    %157 = vector.shape_cast %156 : vector<1x32x128xbf16> to vector<32x128xbf16>
    %158 = arith.truncf %155 : vector<16x32xf32> to vector<16x32xbf16>
    %cst_57 = arith.constant dense<0.000000e+00> : vector<16x128xf32>
    %159 = tpu.matmul %158, %157, %cst_57 {dimension_numbers = #tpu.dot_dimension_numbers<[1], [0], [0], [1], [0, 0, 1, 1], [], []>} : vector<16x32xbf16>, vector<32x128xbf16>, vector<16x128xf32> -> vector<16x128xf32>
    %c0_58 = arith.constant 0 : index
    %c0_59 = arith.constant 0 : index
    %c0_60 = arith.constant 0 : index
    %160 = vector.load %arg11[%c0_58, %c0_59, %c0_60] : memref<1x1x128xf32, #tpu.memory_space<vmem>>, vector<1x1x128xf32>
    %161 = vector.shape_cast %160 : vector<1x1x128xf32> to vector<1x128xf32>
    %162 = vector.broadcast %161 : vector<1x128xf32> to vector<16x128xf32>
    %163 = arith.addf %159, %162 : vector<16x128xf32>
    %cst_61 = arith.constant 5.000000e-01 : f32
    %164 = vector.broadcast %cst_61 : f32 to vector<16x128xf32>
    %165 = arith.mulf %164, %163 : vector<16x128xf32>
    %cst_62 = arith.constant 0.707106769 : f32
    %166 = vector.broadcast %cst_62 : f32 to vector<16x128xf32>
    %167 = arith.mulf %163, %166 : vector<16x128xf32>
    %168 = math.erf %167 : vector<16x128xf32>
    %cst_63 = arith.constant 1.000000e+00 : f32
    %169 = vector.broadcast %cst_63 : f32 to vector<16x128xf32>
    %170 = arith.addf %169, %168 : vector<16x128xf32>
    %171 = arith.mulf %165, %170 : vector<16x128xf32>
    %c0_64 = arith.constant 0 : index
    %c0_65 = arith.constant 0 : index
    %c0_66 = arith.constant 0 : index
    %172 = vector.load %arg12[%c0_64, %c0_65, %c0_66] : memref<1x128x32xbf16, #tpu.memory_space<vmem>>, vector<1x128x32xbf16>
    %173 = vector.shape_cast %172 : vector<1x128x32xbf16> to vector<128x32xbf16>
    %174 = arith.truncf %171 : vector<16x128xf32> to vector<16x128xbf16>
    %cst_67 = arith.constant dense<0.000000e+00> : vector<16x32xf32>
    %175 = tpu.matmul %174, %173, %cst_67 {dimension_numbers = #tpu.dot_dimension_numbers<[1], [0], [0], [1], [0, 0, 1, 1], [], []>} : vector<16x128xbf16>, vector<128x32xbf16>, vector<16x32xf32> -> vector<16x32xf32>
    %c0_68 = arith.constant 0 : index
    %c0_69 = arith.constant 0 : index
    %c0_70 = arith.constant 0 : index
    %176 = vector.load %arg13[%c0_68, %c0_69, %c0_70] : memref<1x1x32xf32, #tpu.memory_space<vmem>>, vector<1x1x32xf32>
    %177 = vector.shape_cast %176 : vector<1x1x32xf32> to vector<1x32xf32>
    %178 = vector.broadcast %177 : vector<1x32xf32> to vector<16x32xf32>
    %179 = arith.addf %175, %178 : vector<16x32xf32>
    %180 = arith.addf %155, %179 : vector<16x32xf32>
    %c0_71 = arith.constant 0 : index
    %c0_72 = arith.constant 0 : index
    %181 = vector.load %arg21[%c0_71, %c0_72] : memref<16x32xf32, #tpu.memory_space<vmem>>, vector<16x32xf32>
    tpu.vector_store %arg21[%c0_71, %c0_72], %180 {strides = array<i32>} : memref<16x32xf32, #tpu.memory_space<vmem>>, vector<16x32xf32>,
    %c1_i32 = arith.constant 1 : i32
    %182 = arith.cmpi eq, %arg0, %c1_i32 : i32
    %183 = arith.extui %182 : i1 to i32
    %c0_i32_73 = arith.constant 0 : i32
    %184 = arith.cmpi ne, %183, %c0_i32_73 : i32
    scf.if %184 {
      %c0_74 = arith.constant 0 : index
      %c0_75 = arith.constant 0 : index
      %185 = vector.load %arg14[%c0_74, %c0_75] : memref<1x32xf32, #tpu.memory_space<vmem>>, vector<1x32xf32>
      %c0_76 = arith.constant 0 : index
      %c0_77 = arith.constant 0 : index
      %186 = vector.load %arg15[%c0_76, %c0_77] : memref<1x32xf32, #tpu.memory_space<vmem>>, vector<1x32xf32>
      %cst_78 = arith.constant dense<0.000000e+00> : vector<16xf32>
      %187 = vector.multi_reduction <add>, %180, %cst_78 [1] : vector<16x32xf32> to vector<16xf32>
      %188 = vector.shape_cast %187 : vector<16xf32> to vector<16x1xf32>
      %cst_79 = arith.constant 3.200000e+01 : f32
      %189 = vector.broadcast %cst_79 : f32 to vector<16x1xf32>
      %190 = arith.divf %188, %189 : vector<16x1xf32>
      %191 = vector.broadcast %190 : vector<16x1xf32> to vector<16x32xf32>
      %192 = arith.subf %180, %191 : vector<16x32xf32>
      %193 = arith.mulf %192, %192 : vector<16x32xf32>
      %cst_80 = arith.constant dense<0.000000e+00> : vector<16xf32>
      %194 = vector.multi_reduction <add>, %193, %cst_80 [1] : vector<16x32xf32> to vector<16xf32>
      %195 = vector.shape_cast %194 : vector<16xf32> to vector<16x1xf32>
      %cst_81 = arith.constant 3.200000e+01 : f32
      %196 = vector.broadcast %cst_81 : f32 to vector<16x1xf32>
      %197 = arith.divf %195, %196 : vector<16x1xf32>
      %198 = vector.broadcast %190 : vector<16x1xf32> to vector<16x32xf32>
      %199 = arith.subf %180, %198 : vector<16x32xf32>
      %cst_82 = arith.constant 9.99999974E-6 : f32
      %200 = vector.broadcast %cst_82 : f32 to vector<16x1xf32>
      %201 = arith.addf %197, %200 : vector<16x1xf32>
      %202 = math.rsqrt %201 : vector<16x1xf32>
      %203 = vector.broadcast %202 : vector<16x1xf32> to vector<16x32xf32>
      %204 = arith.mulf %199, %203 : vector<16x32xf32>
      %205 = vector.broadcast %185 : vector<1x32xf32> to vector<16x32xf32>
      %206 = arith.mulf %204, %205 : vector<16x32xf32>
      %207 = vector.broadcast %186 : vector<1x32xf32> to vector<16x32xf32>
      %208 = arith.addf %206, %207 : vector<16x32xf32>
      %209 = vector.shape_cast %208 : vector<16x32xf32> to vector<2x8x32xf32>
      %c0_83 = arith.constant 0 : index
      %c0_84 = arith.constant 0 : index
      %210 = vector.load %arg16[%c0_83, %c0_84] : memref<1x32xf32, #tpu.memory_space<vmem>>, vector<1x32xf32>
      %211 = vector.shape_cast %210 : vector<1x32xf32> to vector<1x1x32xf32>
      %212 = vector.broadcast %211 : vector<1x1x32xf32> to vector<2x8x32xf32>
      %213 = arith.mulf %209, %212 : vector<2x8x32xf32>
      %cst_85 = arith.constant dense<0.000000e+00> : vector<2x8xf32>
      %214 = vector.multi_reduction <add>, %213, %cst_85 [2] : vector<2x8x32xf32> to vector<2x8xf32>
      %215 = vector.shape_cast %214 : vector<2x8xf32> to vector<2x8x1xf32>
      %c0_86 = arith.constant 0 : index
      %c0_87 = arith.constant 0 : index
      %216 = vector.load %arg17[%c0_86, %c0_87] : memref<1x1xf32, #tpu.memory_space<vmem>>, vector<1x1xf32>
      %217 = vector.shape_cast %216 : vector<1x1xf32> to vector<1x1x1xf32>
      %218 = vector.broadcast %217 : vector<1x1x1xf32> to vector<2x8x1xf32>
      %219 = arith.addf %215, %218 : vector<2x8x1xf32>
      %cst_88 = arith.constant dense<0xFF800000> : vector<2x1xf32>
      %220 = vector.multi_reduction <maximumf>, %219, %cst_88 [1] : vector<2x8x1xf32> to vector<2x1xf32>
      %221 = vector.shape_cast %220 : vector<2x1xf32> to vector<2x1x1xf32>
      %222 = vector.broadcast %221 : vector<2x1x1xf32> to vector<2x8x1xf32>
      %223 = arith.subf %219, %222 : vector<2x8x1xf32>
      %224 = math.exp %223 : vector<2x8x1xf32>
      %cst_89 = arith.constant dense<0.000000e+00> : vector<2x1xf32>
      %225 = vector.multi_reduction <add>, %224, %cst_89 [1] : vector<2x8x1xf32> to vector<2x1xf32>
      %226 = vector.shape_cast %225 : vector<2x1xf32> to vector<2x1x1xf32>
      %227 = tpu.reciprocal %226 {approx = true} : vector<2x1x1xf32> -> vector<2x1x1xf32>
      %228 = vector.broadcast %227 : vector<2x1x1xf32> to vector<2x8x1xf32>
      %229 = arith.mulf %224, %228 : vector<2x8x1xf32>
      %230 = vector.broadcast %229 : vector<2x8x1xf32> to vector<2x8x32xf32>
      %231 = arith.mulf %230, %209 : vector<2x8x32xf32>
      %cst_90 = arith.constant dense<0.000000e+00> : vector<2x32xf32>
      %232 = vector.multi_reduction <add>, %231, %cst_90 [1] : vector<2x8x32xf32> to vector<2x32xf32>
      %c0_91 = arith.constant 0 : index
      %c0_92 = arith.constant 0 : index
      %233 = vector.load %arg18[%c0_91, %c0_92] : memref<32x128xbf16, #tpu.memory_space<vmem>>, vector<32x128xbf16>
      %234 = arith.truncf %232 : vector<2x32xf32> to vector<2x32xbf16>
      %cst_93 = arith.constant dense<0.000000e+00> : vector<2x128xf32>
      %235 = tpu.matmul %234, %233, %cst_93 {dimension_numbers = #tpu.dot_dimension_numbers<[1], [0], [0], [1], [0, 0, 1, 1], [], []>} : vector<2x32xbf16>, vector<32x128xbf16>, vector<2x128xf32> -> vector<2x128xf32>
      %c0_94 = arith.constant 0 : index
      %c0_95 = arith.constant 0 : index
      %236 = vector.load %arg19[%c0_94, %c0_95] : memref<1x128xf32, #tpu.memory_space<vmem>>, vector<1x128xf32>
      %237 = vector.broadcast %236 : vector<1x128xf32> to vector<2x128xf32>
      %238 = arith.addf %235, %237 : vector<2x128xf32>
      %c0_96 = arith.constant 0 : index
      %c0_97 = arith.constant 0 : index
      %239 = vector.load %arg20[%c0_96, %c0_97] : memref<2x128xf32, #tpu.memory_space<vmem>>, vector<2x128xf32>
      tpu.vector_store %arg20[%c0_96, %c0_97], %238 {strides = array<i32>} : memref<2x128xf32, #tpu.memory_space<vmem>>, vector<2x128xf32>,
    } else {
    }
    return
  }
  func.func @transform_0(%arg0: i32) -> (i32, i32, i32) {
    %c0_i32 = arith.constant 0 : i32
    %c0_i32_0 = arith.constant 0 : i32
    %c0_i32_1 = arith.constant 0 : i32
    %c0_i32_2 = arith.constant 0 : i32
    return %c0_i32, %c0_i32_0, %c0_i32_1 : i32, i32, i32
  }
  func.func @transform_1(%arg0: i32) -> (i32, i32, i32) {
    %c0_i32 = arith.constant 0 : i32
    %c0_i32_0 = arith.constant 0 : i32
    %c0_i32_1 = arith.constant 0 : i32
    %c0_i32_2 = arith.constant 0 : i32
    return %c0_i32, %c0_i32_0, %c0_i32_1 : i32, i32, i32
  }
  func.func @transform_2(%arg0: i32) -> (i32, i32, i32) {
    %c0_i32 = arith.constant 0 : i32
    %c0_i32_0 = arith.constant 0 : i32
    %c0_i32_1 = arith.constant 0 : i32
    return %arg0, %c0_i32, %c0_i32_0 : i32, i32, i32
  }
  func.func @transform_3(%arg0: i32) -> (i32, i32, i32) {
    %c0_i32 = arith.constant 0 : i32
    %c0_i32_0 = arith.constant 0 : i32
    %c0_i32_1 = arith.constant 0 : i32
    return %arg0, %c0_i32, %c0_i32_0 : i32, i32, i32
  }
  func.func @transform_4(%arg0: i32) -> (i32, i32, i32) {
    %c0_i32 = arith.constant 0 : i32
    %c0_i32_0 = arith.constant 0 : i32
    %c0_i32_1 = arith.constant 0 : i32
    return %arg0, %c0_i32, %c0_i32_0 : i32, i32, i32
  }
  func.func @transform_5(%arg0: i32) -> (i32, i32, i32) {
    %c0_i32 = arith.constant 0 : i32
    %c0_i32_0 = arith.constant 0 : i32
    %c0_i32_1 = arith.constant 0 : i32
    return %arg0, %c0_i32, %c0_i32_0 : i32, i32, i32
  }
  func.func @transform_6(%arg0: i32) -> (i32, i32, i32) {
    %c0_i32 = arith.constant 0 : i32
    %c0_i32_0 = arith.constant 0 : i32
    %c0_i32_1 = arith.constant 0 : i32
    return %arg0, %c0_i32, %c0_i32_0 : i32, i32, i32
  }
  func.func @transform_7(%arg0: i32) -> (i32, i32, i32) {
    %c0_i32 = arith.constant 0 : i32
    %c0_i32_0 = arith.constant 0 : i32
    %c0_i32_1 = arith.constant 0 : i32
    return %arg0, %c0_i32, %c0_i32_0 : i32, i32, i32
  }
  func.func @transform_8(%arg0: i32) -> (i32, i32, i32) {
    %c0_i32 = arith.constant 0 : i32
    %c0_i32_0 = arith.constant 0 : i32
    %c0_i32_1 = arith.constant 0 : i32
    return %arg0, %c0_i32, %c0_i32_0 : i32, i32, i32
  }
  func.func @transform_9(%arg0: i32) -> (i32, i32, i32) {
    %c0_i32 = arith.constant 0 : i32
    %c0_i32_0 = arith.constant 0 : i32
    %c0_i32_1 = arith.constant 0 : i32
    return %arg0, %c0_i32, %c0_i32_0 : i32, i32, i32
  }
  func.func @transform_10(%arg0: i32) -> (i32, i32, i32) {
    %c0_i32 = arith.constant 0 : i32
    %c0_i32_0 = arith.constant 0 : i32
    %c0_i32_1 = arith.constant 0 : i32
    return %arg0, %c0_i32, %c0_i32_0 : i32, i32, i32
  }
  func.func @transform_11(%arg0: i32) -> (i32, i32, i32) {
    %c0_i32 = arith.constant 0 : i32
    %c0_i32_0 = arith.constant 0 : i32
    %c0_i32_1 = arith.constant 0 : i32
    return %arg0, %c0_i32, %c0_i32_0 : i32, i32, i32
  }
  func.func @transform_12(%arg0: i32) -> (i32, i32, i32) {
    %c0_i32 = arith.constant 0 : i32
    %c0_i32_0 = arith.constant 0 : i32
    %c0_i32_1 = arith.constant 0 : i32
    return %arg0, %c0_i32, %c0_i32_0 : i32, i32, i32
  }
  func.func @transform_13(%arg0: i32) -> (i32, i32) {
    %c0_i32 = arith.constant 0 : i32
    %c0_i32_0 = arith.constant 0 : i32
    %c0_i32_1 = arith.constant 0 : i32
    return %c0_i32, %c0_i32_0 : i32, i32
  }
  func.func @transform_14(%arg0: i32) -> (i32, i32) {
    %c0_i32 = arith.constant 0 : i32
    %c0_i32_0 = arith.constant 0 : i32
    %c0_i32_1 = arith.constant 0 : i32
    return %c0_i32, %c0_i32_0 : i32, i32
  }
  func.func @transform_15(%arg0: i32) -> (i32, i32) {
    %c0_i32 = arith.constant 0 : i32
    %c0_i32_0 = arith.constant 0 : i32
    %c0_i32_1 = arith.constant 0 : i32
    return %c0_i32, %c0_i32_0 : i32, i32
  }
  func.func @transform_16(%arg0: i32) -> (i32, i32) {
    %c0_i32 = arith.constant 0 : i32
    %c0_i32_0 = arith.constant 0 : i32
    %c0_i32_1 = arith.constant 0 : i32
    return %c0_i32, %c0_i32_0 : i32, i32
  }
  func.func @transform_17(%arg0: i32) -> (i32, i32) {
    %c0_i32 = arith.constant 0 : i32
    %c0_i32_0 = arith.constant 0 : i32
    %c0_i32_1 = arith.constant 0 : i32
    return %c0_i32, %c0_i32_0 : i32, i32
  }
  func.func @transform_18(%arg0: i32) -> (i32, i32) {
    %c0_i32 = arith.constant 0 : i32
    %c0_i32_0 = arith.constant 0 : i32
    %c0_i32_1 = arith.constant 0 : i32
    return %c0_i32, %c0_i32_0 : i32, i32
  }
  func.func @transform_19(%arg0: i32) -> (i32, i32) {
    %c0_i32 = arith.constant 0 : i32
    %c0_i32_0 = arith.constant 0 : i32
    %c0_i32_1 = arith.constant 0 : i32
    return %c0_i32, %c0_i32_0 : i32, i32
  }
}

</mosaic_0001>

<bundles_post_ra>
// kernel: transformer_classifier.1
= control target key start
LH: loop header
LB: loop body
LE: loop exit
PB: predicated region body
PF: predicated region fallthrough
CT: control target
= control target key end

     0   :  { %s2956_s20 = smov 0   ;;  %s3311_s0 = inlined_call_operand.vmem [shape: f32[2,8,32], index: 0, kind: input, shape index: {}]   ;;  %s3312_s1 = inlined_call_operand.vmem [shape: f32[1,8,32], index: 1, kind: input, shape index: {}]   ;;  %s3313_s2 = inlined_call_operand.vmem [shape: f32[2,1,32], index: 2, kind: input, shape index: {}]   ;;  %s3314_s3 = inlined_call_operand.vmem [shape: f32[2,1,32], index: 3, kind: input, shape index: {}]   ;;  %s3315_s4 = inlined_call_operand.vmem [shape: bf16[2,32,96], index: 4, kind: input, shape index: {}]   ;;  %s3316_s5 = inlined_call_operand.vmem [shape: bf16[2,32,32], index: 5, kind: input, shape index: {}]   ;;  %s3317_s6 = inlined_call_operand.vmem [shape: f32[2,1,32], index: 6, kind: input, shape index: {}]   ;;  %s3318_s7 = inlined_call_operand.vmem [shape: f32[2,1,32], index: 7, kind: input, shape index: {}]   ;;  %s3319_s8 = inlined_call_operand.vmem [shape: f32[2,1,32], index: 8, kind: input, shape index: {}]   ;;  %s3320_s9 = inlined_call_operand.vmem [shape: bf16[2,32,128], index: 9, kind: input, shape index: {}]   ;;  %s3321_s10 = inlined_call_operand.vmem [shape: f32[2,1,128], index: 10, kind: input, shape index: {}]   ;;  %s3322_s11 = inlined_call_operand.vmem [shape: bf16[2,128,32], index: 11, kind: input, shape index: {}]   ;;  %s3323_s12 = inlined_call_operand.vmem [shape: f32[2,1,32], index: 12, kind: input, shape index: {}]   ;;  %s3324_s13 = inlined_call_operand.vmem [shape: f32[1,32], index: 13, kind: input, shape index: {}]   ;;  %s3325_s14 = inlined_call_operand.vmem [shape: f32[1,32], index: 14, kind: input, shape index: {}]   ;;  %s3326_s15 = inlined_call_operand.vmem [shape: f32[1,32], index: 15, kind: input, shape index: {}]   ;;  %s3327_s16 = inlined_call_operand.<no memory space> [shape: f32[1,1], index: 16, kind: input, shape index: {}]   ;;  %s3328_s17 = inlined_call_operand.vmem [shape: bf16[32,128], index: 17, kind: input, shape index: {}]   ;;  %s3329_s18 = inlined_call_operand.vmem [shape: f32[1,128], index: 18, kind: input, shape index: {}]   ;;  %s3330_s19 = inlined_call_operand.vmem [shape: f32[2,128], index: 19, kind: output, shape index: {}]  }
   0x1   :  { %3334 = sst [smem:[#allocation5_spill]] %s3311_s0  ;;  %v24_v0 = vstv %s3327_s16 }
   0x2   :  { %3335 = sst [smem:[#allocation6_spill]] %s3312_s1  ;;  %25 = vst [vmem:[#allocation3] sm:$0x1] %v24_v0 }
   0x3   :  { %3336 = sst [smem:[#allocation7_spill]] %s3313_s2 }
   0x4   :  { %3337 = sst [smem:[#allocation8_spill]] %s3314_s3 }
   0x5   :  { %3338 = sst [smem:[#allocation9_spill]] %s3315_s4 }
   0x6   :  { %3339 = sst [smem:[#allocation10_spill]] %s3316_s5 }
   0x7   :  { %3340 = sst [smem:[#allocation11_spill]] %s3328_s17 }
   0x8   :  { %3341 = sst [smem:[#allocation12_spill]] %s3329_s18 }
   0x9   :  { %3342 = sst [smem:[#allocation13_spill]] %s3330_s19 }
   0xa LB: > { %3343 = sst [smem:[#allocation4_spill]] %s2832_s20  ;;  %s2962_s21 = sadd.s32 4294967295, %s2832_s20   ;;  %s2832_s20 = sphi %s2956_s20, %s31_s20  }
   0xb   : > { %p2444_p0 = scmp.ge.s32.totalorder %s2832_s20, 1  ;;  %p620_p1 = scmp.lt.s32.totalorder %s2832_s20, 3 }
   0xd   : > { %p621_p2 = pnand %p2444_p0, %p620_p1 }
   0xe   : > { %p707_p3 = scmp.lt.s32.totalorder (!%p621_p2), %s2962_s21, 1  ;;  %s3346_s4 = sld [smem:[#allocation9_spill]] (!%p621_p2) }
   0xf   : > { %624 = sbr.rel (%p621_p2) target bundleno = 5060 (0x13c4), region = 96  ;;  %s3347_s5 = sld [smem:[#allocation10_spill]] (!%p621_p2) }
  0x10   : > { %p2453_p4 = scmp.ne.s32.totalorder (!%p621_p2), %s2962_s21, 0 }
  0x16   : > { %s2968_s16 = scalar_select %p707_p3, %s2962_s21, 1 }
  0x17   : > { %752 = sbr.rel (%p2453_p4) target bundleno = 38 (0x26), region = 100  ;;  %s3348_s3 = sld [smem:[#allocation5_spill]] (!%p2453_p4)  ;;  %vm758_vm0 = vcmask (!%p2453_p4), 261120  }
  0x18   : > { %s2505_s27 = sshll.u32 %s2968_s16, 4  ;;  %s731_s26 = scalar_lea.vmem %s3319_s8, %s2968_s16 }
  0x19   : > { %s2986_s22 = scalar_lea.vmem %s3346_s4, %s2505_s27  ;;  %s2991_s18 = scalar_lea.vmem %s3347_s5, %s2505_s27 }
  0x1a   : > { %s3004_s0 = scalar_lea.vmem %s3320_s9, %s2505_s27  ;;  %s739_s4 = scalar_lea.vmem %s3321_s10, %s2968_s16 }
  0x1b   : > { %s2508_s19 = sshll.u32 %s2968_s16, 6  ;;  %s747_s17 = scalar_lea.vmem %s3323_s12, %s2968_s16 }
  0x1c   : > { %s3018_s24 = scalar_lea.vmem %s3322_s11, %s2508_s19  ;;  %s3349_s30 = sld [smem:[#allocation6_spill]] (!%p2453_p4) }
  0x1d   : > { %v753_v1 = vld [vmem:[%s3348_s3] sm:$0xff] (!%p2453_p4)  ;;  %v754_v3 = vld [vmem:[%s3348_s3 + $0x8] sm:$0xff] (!%p2453_p4) }
  0x22   : > { %v755_v2 = vld [vmem:[%s3349_s30] sm:$0xff] }
  0x23   : > { %v756_v4 = vadd.f32 %v755_v2, %v753_v1  ;;  %v757_v5 = vadd.f32 %v755_v2, %v754_v3 }
  0x25   : > { %759 = vst.msk [vmem:[#allocation2] sm:$0xff] %vm758_vm0, %v756_v4  ;;  %760 = vst.msk [vmem:[#allocation2 + $0x8] sm:$0xff] %vm758_vm0, %v757_v5 }
  0x26 PF: > { %vm765_vm1 = vcmask 261120   ;;  %v2752_v20 = vld [vmem:[%s2986_s22] sm:$0xff]   ;;  %v2834_v21 = vmov 0.0   ;;  %v2753_v22 = vld [vmem:[%s2986_s22 + $0x8] sm:$0xff]   ;;  %vm2835_vm2 = vmmov 0   ;;  %s3350_s20 = sld [smem:[#allocation7_spill]] }
  0x27   : > { %2562 = vmatprep.subr.bf16.mxu0 %v2834_v21  ;;  %2582 = vmatprep.subr.bf16.mxu1 %v2834_v21  ;;  %s3352_s27 = sld [smem:[#allocation8_spill]]  ;;  %s2836_s29 = smov 96   ;;  %vm875_vm3 = vcmask 64512   ;;  %vm1002_vm4 = vcmask 1043456   ;;  %vm1786_vm5 = vcmask 130048   ;;  %vm1789_vm6 = vcmask 195584  }
  0x28   : > { %2563 = vmatpush3.bf16.msra.mxu0 %v2752_v20  ;;  %2566 = vmatprep.mubr.msk.bf16.mxu0 %vm2835_vm2, %v2834_v21  ;;  %s2837_s30 = smov 64   ;;  %s2838_s1 = smov 88  }
  0x29   : > { %2564 = vmatprep.subr.bf16.mxu0 %v2834_v21  ;;  %2584 = vmatprep.mubr.msk.bf16.mxu1 %vm2835_vm2, %v2834_v21  ;;  %s2839_s5 = smov 120   ;;  %s2840_s22 = smov 56  }
  0x2a   : > { %s2841_s19 = smov 80   ;;  %s2844_s2 = smov 72  }
  0x2b   : > { %s2845_s25 = smov 104   ;;  %p2494_p5 = scmp.ne.s32.totalorder %s2962_s21, 1 }
  0x2c   : > { %v3030_v6 = vld [vmem:[#allocation2] sm:$0xff]  ;;  %v3032_v7 = vld [vmem:[#allocation2 + $0x8] sm:$0xff]  ;;  %2565 = vmatpush3.bf16.msra.mxu0 %v2753_v22  ;;  %s3351_s23 = scalar_lea.vmem %s3350_s20, %s2968_s16  ;;  %s2842_s20 = smov 112   ;;  %vm2173_vm7 = vcmask (!%p2494_p5), 7168   ;;  %vm2852_vm8 = vmmov (!%p2494_p5), 0   ;;  %vm2255_vm9 = vcmask (!%p2494_p5), 1041409  }
  0x2d   : > { %v766_v8 = vsel %vm765_vm1, %v3030_v6, 0.0  ;;  %v769_v9 = vsel %vm765_vm1, %v3032_v7, 0.0  ;;  %2570 = vmatprep.subr.bf16.mxu0 %v2834_v21  ;;  %v2454_v31 = vld [vmem:[%s3351_s23] ss:$0 sm:$0xff]  ;;  %s3353_s28 = scalar_lea.vmem %s3352_s27, %s2968_s16  ;;  %s2843_s23 = smov 48  }
  0x2e   : > { %767 = vadd.xlane.f32.xlu0 %v766_v8  ;;  %v2455_v35 = vld [vmem:[%s3353_s28] ss:$0 sm:$0xff]  ;;  %s2846_s27 = smov 40   ;;  %s2847_s28 = smov 8  }
  0x32   : > { %770 = vadd.xlane.f32.xlu0 %v769_v9 }
  0xbb   : > { %v768_v10 = vpop.xlane.xlu0 %767 }
  0xbc   : > { %v773_v11 = vmul.f32 0.03125, %v768_v10 }
  0xbe   : > { %v775_v12 = vsub.f32 %v3030_v6, %v773_v11 }
  0xbf   : > { %v771_v13 = vpop.xlane.xlu0 %770 }
  0xc0   : > { %v774_v14 = vmul.f32 0.03125, %v771_v13  ;;  %v777_v15 = vmul.f32 %v775_v12, %v775_v12 }
  0xc2   : > { %v776_v16 = vsub.f32 %v3032_v7, %v774_v14  ;;  %v779_v17 = vsel %vm765_vm1, %v777_v15, 0.0 }
  0xc3   : > { %780 = vadd.xlane.f32.xlu1 %v779_v17 }
  0xc4   : > { %v778_v18 = vmul.f32 %v776_v16, %v776_v16 }
  0xc6   : > { %v782_v19 = vsel %vm765_vm1, %v778_v18, 0.0 }
  0xc7   : > { %783 = vadd.xlane.f32.xlu1 %v782_v19 }
 0x150   : > { %v781_v23 = vpop.xlane.xlu1 %780 }
 0x151   : > { %v785_v24 = vmul.f32 0.03125, %v781_v23 }
 0x153   : > { %v787_v25 = vadd.f32 1e-05, %v785_v24 }
 0x154   : > { %v784_v26 = vpop.xlane.xlu1 %783 }
 0x155   : > { %2766 = vrsqrt.f32 %v787_v25  ;;  %v786_v27 = vmul.f32 0.03125, %v784_v26 }
 0x157   : > { %v788_v28 = vadd.f32 1e-05, %v786_v27 }
 0x159   : > { %2768 = vrsqrt.f32 %v788_v28 }
 0x15f   : > { %v2767_v29 = vpop.eup %2766 }
 0x160   : > { %v791_v30 = vmul.f32 %v2767_v29, %v775_v12 }
 0x162   : > { %v799_v34 = vmul.f32 %v2454_v31, %v791_v30 }
 0x163   : > { %v2769_v32 = vpop.eup %2768 }
 0x164   : > { %v792_v33 = vmul.f32 %v2769_v32, %v776_v16  ;;  %v807_v37 = vadd.f32 %v2455_v35, %v799_v34 }
 0x166   : > { %v800_v36 = vmul.f32 %v2454_v31, %v792_v33 }
 0x168   : > { %v808_v38 = vadd.f32 %v2455_v35, %v800_v36 }
 0x16a   : > { %v813_v39 = vpack.c.bf16 %v808_v38, %v807_v37 }
 0x16c   : > { %2567 = vmatmul.mubr.msk.bf16.vlgmr.msra.gmra.mrb[0].mxu0 %vm765_vm1, %v813_v39 }
 0x16d   : > { %2572 = vmatprep.mubr.msk.bf16.mxu0 %vm2835_vm2, %v2834_v21 }
 0x23f   : > { %v863_v40 = vpop.f32.mrb[0].mxu0 }
 0x240   : > { %v3065_v41 = vpack.c.bf16 %v863_v40, %v863_v40  ;;  %v2568_v42 = vpop.f32.mrb[1].mxu0 }
 0x241   : > { %v866_v43 = vpop.f32.mrb[2].mxu0 }
 0x242   : > { %v3067_v44 = vpack.c.bf16 %v866_v43, %v866_v43  ;;  %873 = vrot.lane.b32.xlu0 %v3065_v41, %s2836_s29  ;;  %v2569_v45 = vpop.f32.mrb[3].mxu0 }
 0x244   : > { %923 = vrot.lane.b32.xlu1 %v3067_v44, %s2836_s29  ;;  %s2848_s29 = smov 16  }
 0x2b4   : > { %v874_v46 = vpop.permute.xlu0 %873 }
 0x2b5   : > { %v880_v47 = vsel %vm875_vm3, %v874_v46, 0 }
 0x2b6   : > { %2571 = vmatpush3.bf16.xpose.msra.mxu0 %v880_v47  ;;  %v924_v48 = vpop.permute.xlu1 %923 }
 0x2b7   : > { %2576 = vmatprep.subr.bf16.mxu0 %v2834_v21  ;;  %v929_v49 = vsel %vm875_vm3, %v924_v48, 0 }
 0x2bd   : > { %2573 = vmatmul.mubr.msk.bf16.vlgmr.msra.gmra.mrb[4].mxu0 %vm875_vm3, %v3065_v41 }
 0x2be   : > { %2577 = vmatpush3.bf16.xpose.msra.mxu0 %v929_v49  ;;  %2578 = vmatprep.mubr.msk.bf16.mxu0 %vm2835_vm2, %v2834_v21 }
 0x2bf   : > { %2588 = vmatprep.subr.bf16.mxu0 %v2834_v21 }
 0x2c5   : > { %2579 = vmatmul.mubr.msk.bf16.vlgmr.msra.gmra.mrb[8].mxu0 %vm875_vm3, %v3067_v44 }
 0x2c6   : > { %2590 = vmatprep.mubr.msk.bf16.mxu0 %vm2835_vm2, %v2834_v21 }
 0x390   : > { %v916_v50 = vpop.f32.mrb[4].mxu0 }
 0x391   : > { %v971_v51 = vmul.f32 0.35355338, %v916_v50  ;;  %v2574_v52 = vpop.f32.mrb[5].mxu0 }
 0x392   : > { %v919_v53 = vpop.f32.mrb[6].mxu0 }
 0x393   : > { %v2575_v54 = vpop.f32.mrb[7].mxu0  ;;  %v973_v55 = vsel %vm875_vm3, %v971_v51, -inf }
 0x394   : > { %974 = vmax.xlane.f32.xlu1 %v973_v55 }
 0x398   : > { %v965_v56 = vpop.f32.mrb[8].mxu0 }
 0x399   : > { %v972_v57 = vmul.f32 0.35355338, %v965_v56  ;;  %v2580_v58 = vpop.f32.mrb[9].mxu0 }
 0x39a   : > { %v968_v59 = vpop.f32.mrb[10].mxu0 }
 0x39b   : > { %v2581_v60 = vpop.f32.mrb[11].mxu0  ;;  %v976_v61 = vsel %vm875_vm3, %v972_v57, -inf }
 0x39c   : > { %977 = vmax.xlane.f32.xlu0 %v976_v61 }
 0x3a5   : > { %1046 = vrot.lane.b32.xlu1 %v3067_v44, %s2837_s30 }
 0x3a9   : > { %1096 = vrot.lane.b32.xlu1 %v3065_v41, %s2838_s1 }
 0x421   : > { %v975_v62 = vpop.xlane.xlu1 %974 }
 0x422   : > { %v979_v63 = vsub.f32 %v971_v51, %v975_v62 }
 0x424   : > { %v981_v0 = vmul.f32 1.442695, %v979_v63 }
 0x425   : > { %v1047_v1 = vpop.permute.xlu1 %1046 }
 0x426   : > { %2770 = vpow2.f32 %v981_v0  ;;  %v1052_v2 = vsel %vm1002_vm4, %v1047_v1, 0 }
 0x427   : > { %2589 = vmatpush3.bf16.msra.mxu0 %v1052_v2 }
 0x428   : > { %2600 = vmatprep.subr.bf16.mxu0 %v2834_v21 }
 0x429   : > { %v978_v3 = vpop.xlane.xlu0 %977  ;;  %v1097_v13 = vpop.permute.xlu1 %1096 }
 0x42a   : > { %v980_v4 = vsub.f32 %v972_v57, %v978_v3  ;;  %v1102_v20 = vsel %vm875_vm3, %v1097_v13, 0 }
 0x42c   : > { %v983_v5 = vmul.f32 1.442695, %v980_v4 }
 0x42e   : > { %2772 = vpow2.f32 %v983_v5 }
 0x430   : > { %v2771_v8 = vpop.eup %2770 }
 0x431   : > { %v985_v9 = vsel %vm875_vm3, %v2771_v8, 0.0 }
 0x432   : > { %986 = vadd.xlane.f32.xlu0 %v985_v9 }
 0x438   : > { %v2773_v10 = vpop.eup %2772 }
 0x439   : > { %v988_v11 = vsel %vm875_vm3, %v2773_v10, 0.0 }
 0x43a   : > { %989 = vadd.xlane.f32.xlu1 %v988_v11 }
 0x448   : > { %997 = vrot.lane.b32.xlu0 %v3065_v41, %s2837_s30  ;;  %s2849_s30 = smov 24  }
 0x44b   : > { %1146 = vrot.lane.b32.xlu1 %v3067_v44, %s2838_s1 }
 0x44c   : > { %1094 = vrot.lane.b32.xlu0 %v3065_v41, %s2839_s5 }
 0x44f   : > { %1144 = vrot.lane.b32.xlu1 %v3067_v44, %s2839_s5  ;;  %s3354_s5 = scalar_lea.vmem %s3317_s6, %s2968_s16 }
 0x4bf   : > { %v987_v12 = vpop.xlane.xlu0 %986 }
 0x4c0   : > { %2774 = vrcp.f32 %v987_v12 }
 0x4c3   : > { %v998_v14 = vpop.permute.xlu0 %997 }
 0x4c4   : > { %v1004_v15 = vsel %vm1002_vm4, %v998_v14, 0 }
 0x4c5   : > { %2583 = vmatpush3.bf16.msra.mxu1 %v1004_v15 }
 0x4c6   : > { %2594 = vmatprep.subr.bf16.mxu1 %v2834_v21 }
 0x4c7   : > { %v990_v16 = vpop.xlane.xlu1 %989  ;;  %v1095_v26 = vpop.permute.xlu0 %1094 }
 0x4c8   : > { %2776 = vrcp.f32 %v990_v16 }
 0x4ca   : > { %v2775_v17 = vpop.eup %2774 }
 0x4cb   : > { %v993_v18 = vmul.f32 %v2775_v17, %v2771_v8  ;;  %v1147_v24 = vpop.permute.xlu1 %1146 }
 0x4cc   : > { %v1152_v27 = vsel %vm875_vm3, %v1147_v24, 0 }
 0x4cd   : > { %v995_v19 = vpack.c.bf16 %v993_v18, %v993_v18 }
 0x4cf   : > { %2585 = vmatmul.mubr.msk.bf16.vlgmr.msra.gmra.mrb[0].mxu1 %vm875_vm3, %v995_v19  ;;  %v1145_v28 = vpop.permute.xlu1 %1144 }
 0x4d0   : > { %2595 = vmatpush3.bf16.xpose.msra.mxu1 %v1102_v20  ;;  %2596 = vmatprep.mubr.msk.bf16.mxu1 %vm2835_vm2, %v2834_v21 }
 0x4d1   : > { %2606 = vmatprep.subr.bf16.mxu1 %v2834_v21 }
 0x4d2   : > { %v2777_v22 = vpop.eup %2776 }
 0x4d3   : > { %v994_v23 = vmul.f32 %v2777_v22, %v2773_v10 }
 0x4d5   : > { %v996_v25 = vpack.c.bf16 %v994_v23, %v994_v23 }
 0x4d7   : > { %2591 = vmatmul.mubr.msk.bf16.vlgmr.msra.gmra.mrb[12].mxu0 %vm875_vm3, %v996_v25  ;;  %2597 = vmatmul.mubr.msk.bf16.vlgmr.msra.gmra.mrb[4].mxu1 %vm875_vm3, %v1095_v26 }
 0x4d8   : > { %2601 = vmatpush3.bf16.xpose.msra.mxu0 %v1152_v27  ;;  %2602 = vmatprep.mubr.msk.bf16.mxu0 %vm2835_vm2, %v2834_v21 }
 0x4d9   : > { %2612 = vmatprep.subr.bf16.mxu0 %v2834_v21  ;;  %2608 = vmatprep.mubr.msk.bf16.mxu1 %vm2835_vm2, %v2834_v21 }
 0x4df   : > { %2603 = vmatmul.mubr.msk.bf16.vlgmr.msra.gmra.mrb[16].mxu0 %vm875_vm3, %v1145_v28 }
 0x4e0   : > { %2614 = vmatprep.mubr.msk.bf16.mxu0 %vm2835_vm2, %v2834_v21 }
 0x5a2   : > { %v3113_v29 = vpop.f32.mrb[0].mxu1 }
 0x5a3   : > { %v2586_v30 = vpop.f32.mrb[1].mxu1 }
 0x5a4   : > { %v1043_v31 = vpop.f32.mrb[2].mxu1 }
 0x5a5   : > { %v2587_v32 = vpop.f32.mrb[3].mxu1 }
 0x5aa   : > { %v3115_v33 = vpop.f32.mrb[12].mxu0  ;;  %v1138_v34 = vpop.f32.mrb[4].mxu1 }
 0x5ab   : > { %v1194_v35 = vmul.f32 0.35355338, %v1138_v34  ;;  %v2592_v36 = vpop.f32.mrb[13].mxu0  ;;  %v2598_v37 = vpop.f32.mrb[5].mxu1 }
 0x5ac   : > { %v1091_v38 = vpop.f32.mrb[14].mxu0  ;;  %v1141_v39 = vpop.f32.mrb[6].mxu1 }
 0x5ad   : > { %v2593_v40 = vpop.f32.mrb[15].mxu0  ;;  %v2599_v42 = vpop.f32.mrb[7].mxu1  ;;  %v1196_v43 = vsel %vm875_vm3, %v1194_v35, -inf }
 0x5ae   : > { %1197 = vmax.xlane.f32.xlu0 %v1196_v43 }
 0x5b2   : > { %v1188_v45 = vpop.f32.mrb[16].mxu0 }
 0x5b3   : > { %v1195_v46 = vmul.f32 0.35355338, %v1188_v45  ;;  %v2604_v47 = vpop.f32.mrb[17].mxu0 }
 0x5b4   : > { %v1191_v48 = vpop.f32.mrb[18].mxu0 }
 0x5b5   : > { %v2605_v49 = vpop.f32.mrb[19].mxu0  ;;  %v1199_v50 = vsel %vm875_vm3, %v1195_v46, -inf }
 0x5b6   : > { %1200 = vmax.xlane.f32.xlu1 %v1199_v50 }
 0x5c7   : > { %1268 = vrot.lane.b32.xlu1 %v3067_v44, %s2840_s22 }
 0x5cb   : > { %1318 = vrot.lane.b32.xlu1 %v3065_v41, %s2841_s19 }
 0x5cf   : > { %1368 = vrot.lane.b32.xlu1 %v3067_v44, %s2841_s19  ;;  %s3355_s19 = scalar_lea.vmem %s3318_s7, %s2968_s16 }
 0x5d3   : > { %1366 = vrot.lane.b32.xlu1 %v3067_v44, %s2842_s20 }
 0x63b   : > { %v1198_v51 = vpop.xlane.xlu0 %1197 }
 0x63c   : > { %v1202_v52 = vsub.f32 %v1194_v35, %v1198_v51 }
 0x63e   : > { %v1204_v53 = vmul.f32 1.442695, %v1202_v52 }
 0x640   : > { %2778 = vpow2.f32 %v1204_v53 }
 0x643   : > { %v1201_v54 = vpop.xlane.xlu1 %1200 }
 0x644   : > { %v1203_v55 = vsub.f32 %v1195_v46, %v1201_v54 }
 0x646   : > { %v1206_v56 = vmul.f32 1.442695, %v1203_v55 }
 0x647   : > { %v1269_v57 = vpop.permute.xlu1 %1268 }
 0x648   : > { %2780 = vpow2.f32 %v1206_v56  ;;  %v1274_v58 = vsel %vm1002_vm4, %v1269_v57, 0 }
 0x649   : > { %2613 = vmatpush3.bf16.msra.mxu0 %v1274_v58 }
 0x64a   : > { %v2779_v59 = vpop.eup %2778  ;;  %2624 = vmatprep.subr.bf16.mxu0 %v2834_v21 }
 0x64b   : > { %v1208_v60 = vsel %vm875_vm3, %v2779_v59, 0.0  ;;  %v1319_v8 = vpop.permute.xlu1 %1318 }
 0x64c   : > { %1209 = vadd.xlane.f32.xlu0 %v1208_v60  ;;  %v1324_v12 = vsel %vm875_vm3, %v1319_v8, 0 }
 0x64f   : > { %v1369_v11 = vpop.permute.xlu1 %1368 }
 0x650   : > { %v1374_v14 = vsel %vm875_vm3, %v1369_v11, 0 }
 0x652   : > { %v2781_v61 = vpop.eup %2780 }
 0x653   : > { %v1211_v62 = vsel %vm875_vm3, %v2781_v61, 0.0  ;;  %v1367_v16 = vpop.permute.xlu1 %1366 }
 0x654   : > { %1212 = vadd.xlane.f32.xlu0 %v1211_v62 }
 0x66a   : > { %1220 = vrot.lane.b32.xlu0 %v3065_v41, %s2840_s22 }
 0x66e   : > { %1316 = vrot.lane.b32.xlu0 %v3065_v41, %s2842_s20 }
 0x6d9   : > { %v1210_v63 = vpop.xlane.xlu0 %1209 }
 0x6da   : > { %2782 = vrcp.f32 %v1210_v63 }
 0x6e1   : > { %v1213_v0 = vpop.xlane.xlu0 %1212 }
 0x6e2   : > { %2784 = vrcp.f32 %v1213_v0 }
 0x6e4   : > { %v2783_v1 = vpop.eup %2782 }
 0x6e5   : > { %v1216_v2 = vmul.f32 %v2783_v1, %v2779_v59  ;;  %v1221_v3 = vpop.permute.xlu0 %1220 }
 0x6e6   : > { %v1226_v4 = vsel %vm1002_vm4, %v1221_v3, 0 }
 0x6e7   : > { %2607 = vmatpush3.bf16.msra.mxu1 %v1226_v4  ;;  %v1218_v5 = vpack.c.bf16 %v1216_v2, %v1216_v2 }
 0x6e8   : > { %2618 = vmatprep.subr.bf16.mxu1 %v2834_v21 }
 0x6e9   : > { %v1317_v15 = vpop.permute.xlu0 %1316 }
 0x6ea   : > { %2609 = vmatmul.mubr.msk.bf16.vlgmr.msra.gmra.mrb[8].mxu1 %vm875_vm3, %v1218_v5 }
 0x6eb   : > { %2620 = vmatprep.mubr.msk.bf16.mxu1 %vm2835_vm2, %v2834_v21 }
 0x6ec   : > { %v2785_v9 = vpop.eup %2784 }
 0x6ed   : > { %v1217_v10 = vmul.f32 %v2785_v9, %v2781_v61 }
 0x6ef   : > { %v1219_v13 = vpack.c.bf16 %v1217_v10, %v1217_v10 }
 0x6f0   : > { %2619 = vmatpush3.bf16.xpose.msra.mxu1 %v1324_v12 }
 0x6f1   : > { %2615 = vmatmul.mubr.msk.bf16.vlgmr.msra.gmra.mrb[20].mxu0 %vm875_vm3, %v1219_v13  ;;  %2630 = vmatprep.subr.bf16.mxu1 %v2834_v21 }
 0x6f2   : > { %2625 = vmatpush3.bf16.xpose.msra.mxu0 %v1374_v14  ;;  %2626 = vmatprep.mubr.msk.bf16.mxu0 %vm2835_vm2, %v2834_v21 }
 0x6f3   : > { %2636 = vmatprep.subr.bf16.mxu0 %v2834_v21 }
 0x6f7   : > { %2621 = vmatmul.mubr.msk.bf16.vlgmr.msra.gmra.mrb[12].mxu1 %vm875_vm3, %v1317_v15 }
 0x6f8   : > { %2632 = vmatprep.mubr.msk.bf16.mxu1 %vm2835_vm2, %v2834_v21 }
 0x6f9   : > { %2627 = vmatmul.mubr.msk.bf16.vlgmr.msra.gmra.mrb[24].mxu0 %vm875_vm3, %v1367_v16 }
 0x6fa   : > { %2638 = vmatprep.mubr.msk.bf16.mxu0 %vm2835_vm2, %v2834_v21 }
 0x7bd   : > { %v3147_v17 = vpop.f32.mrb[8].mxu1 }
 0x7be   : > { %v2610_v18 = vpop.f32.mrb[9].mxu1 }
 0x7bf   : > { %v1265_v19 = vpop.f32.mrb[10].mxu1 }
 0x7c0   : > { %v2611_v20 = vpop.f32.mrb[11].mxu1 }
 0x7c4   : > { %v3149_v22 = vpop.f32.mrb[20].mxu0 }
 0x7c5   : > { %v2737_v23 = vpack.i.bf16 %v3149_v22, %v3147_v17  ;;  %v2616_v24 = vpop.f32.mrb[21].mxu0 }
 0x7c6   : > { %v1313_v25 = vpop.f32.mrb[22].mxu0 }
 0x7c7   : > { %v2617_v26 = vpop.f32.mrb[23].mxu0 }
 0x7ca   : > { %v1360_v27 = vpop.f32.mrb[12].mxu1 }
 0x7cb   : > { %v1416_v28 = vmul.f32 0.35355338, %v1360_v27  ;;  %v2622_v30 = vpop.f32.mrb[13].mxu1 }
 0x7cc   : > { %v1363_v31 = vpop.f32.mrb[14].mxu1  ;;  %v1410_v32 = vpop.f32.mrb[24].mxu0 }
 0x7cd   : > { %v1417_v34 = vmul.f32 0.35355338, %v1410_v32  ;;  %v2623_v35 = vpop.f32.mrb[15].mxu1  ;;  %v2628_v36 = vpop.f32.mrb[25].mxu0  ;;  %v1418_v37 = vsel %vm875_vm3, %v1416_v28, -inf }
 0x7ce   : > { %1419 = vmax.xlane.f32.xlu0 %v1418_v37  ;;  %v1413_v38 = vpop.f32.mrb[26].mxu0 }
 0x7cf   : > { %v2629_v39 = vpop.f32.mrb[27].mxu0  ;;  %v1421_v40 = vsel %vm875_vm3, %v1417_v34, -inf }
 0x7d0   : > { %1422 = vmax.xlane.f32.xlu1 %v1421_v40 }
 0x7e1   : > { %1490 = vrot.lane.b32.xlu1 %v3067_v44, %s2843_s23 }
 0x7e5   : > { %1540 = vrot.lane.b32.xlu1 %v3065_v41, %s2844_s2 }
 0x7e9   : > { %1590 = vrot.lane.b32.xlu1 %v3067_v44, %s2844_s2 }
 0x7ed   : > { %1588 = vrot.lane.b32.xlu1 %v3067_v44, %s2845_s25 }
 0x85b   : > { %v1420_v42 = vpop.xlane.xlu0 %1419 }
 0x85c   : > { %v1424_v43 = vsub.f32 %v1416_v28, %v1420_v42 }
 0x85d   : > { %v1423_v45 = vpop.xlane.xlu1 %1422 }
 0x85e   : > { %v1426_v46 = vmul.f32 1.442695, %v1424_v43  ;;  %v1425_v47 = vsub.f32 %v1417_v34, %v1423_v45 }
 0x860   : > { %2786 = vpow2.f32 %v1426_v46  ;;  %v1428_v48 = vmul.f32 1.442695, %v1425_v47 }
 0x861   : > { %v1491_v49 = vpop.permute.xlu1 %1490 }
 0x862   : > { %2788 = vpow2.f32 %v1428_v48  ;;  %v1496_v50 = vsel %vm1002_vm4, %v1491_v49, 0 }
 0x863   : > { %2637 = vmatpush3.bf16.msra.mxu0 %v1496_v50 }
 0x864   : > { %2648 = vmatprep.subr.bf16.mxu0 %v2834_v21 }
 0x865   : > { %v1541_v60 = vpop.permute.xlu1 %1540 }
 0x866   : > { %v1546_v2 = vsel %vm875_vm3, %v1541_v60, 0 }
 0x869   : > { %v1591_v1 = vpop.permute.xlu1 %1590 }
 0x86a   : > { %v2787_v51 = vpop.eup %2786  ;;  %v1596_v4 = vsel %vm875_vm3, %v1591_v1, 0 }
 0x86b   : > { %v1430_v52 = vsel %vm875_vm3, %v2787_v51, 0.0 }
 0x86c   : > { %v2789_v53 = vpop.eup %2788  ;;  %1431 = vadd.xlane.f32.xlu0 %v1430_v52 }
 0x86d   : > { %v1433_v54 = vsel %vm875_vm3, %v2789_v53, 0.0  ;;  %v1589_v8 = vpop.permute.xlu1 %1588 }
 0x870   : > { %1434 = vadd.xlane.f32.xlu0 %v1433_v54 }
 0x886   : > { %1442 = vrot.lane.b32.xlu0 %v3065_v41, %s2843_s23 }
 0x88a   : > { %1538 = vrot.lane.b32.xlu0 %v3065_v41, %s2845_s25 }
 0x8f9   : > { %v1432_v55 = vpop.xlane.xlu0 %1431 }
 0x8fa   : > { %2790 = vrcp.f32 %v1432_v55  ;;  %v2754_v55 = vld [vmem:[%s2991_s18] sm:$0xff]  }
 0x8fd   : > { %v1435_v56 = vpop.xlane.xlu0 %1434 }
 0x8fe   : > { %2792 = vrcp.f32 %v1435_v56  ;;  %v2755_v56 = vld [vmem:[%s2991_s18 + $0x8] sm:$0xff]   ;;  %s3356_s18 = sld [smem:[#allocation11_spill]] (!%p2494_p5) }
 0x901   : > { %v1443_v57 = vpop.permute.xlu0 %1442 }
 0x902   : > { %v1448_v58 = vsel %vm1002_vm4, %v1443_v57, 0 }
 0x903   : > { %2631 = vmatpush3.bf16.msra.mxu1 %v1448_v58 }
 0x904   : > { %v2791_v59 = vpop.eup %2790  ;;  %2642 = vmatprep.subr.bf16.mxu1 %v2834_v21 }
 0x905   : > { %v1438_v61 = vmul.f32 %v2791_v59, %v2787_v51  ;;  %v1539_v5 = vpop.permute.xlu0 %1538 }
 0x907   : > { %v1440_v62 = vpack.c.bf16 %v1438_v61, %v1438_v61 }
 0x908   : > { %v2793_v63 = vpop.eup %2792 }
 0x909   : > { %v1439_v0 = vmul.f32 %v2793_v63, %v2789_v53  ;;  %2633 = vmatmul.mubr.msk.bf16.vlgmr.msra.gmra.mrb[16].mxu1 %vm875_vm3, %v1440_v62 }
 0x90a   : > { %2644 = vmatprep.mubr.msk.bf16.mxu1 %vm2835_vm2, %v2834_v21 }
 0x90b   : > { %v1441_v3 = vpack.c.bf16 %v1439_v0, %v1439_v0 }
 0x90c   : > { %2643 = vmatpush3.bf16.xpose.msra.mxu1 %v1546_v2 }
 0x90d   : > { %2639 = vmatmul.mubr.msk.bf16.vlgmr.msra.gmra.mrb[28].mxu0 %vm875_vm3, %v1441_v3  ;;  %2654 = vmatprep.subr.bf16.mxu1 %v2834_v21 }
 0x90e   : > { %2649 = vmatpush3.bf16.xpose.msra.mxu0 %v1596_v4  ;;  %2650 = vmatprep.mubr.msk.bf16.mxu0 %vm2835_vm2, %v2834_v21 }
 0x90f   : > { %2660 = vmatprep.subr.bf16.mxu0 %v2834_v21 }
 0x913   : > { %2645 = vmatmul.mubr.msk.bf16.vlgmr.msra.gmra.mrb[20].mxu1 %vm875_vm3, %v1539_v5 }
 0x914   : > { %2656 = vmatprep.mubr.msk.bf16.mxu1 %vm2835_vm2, %v2834_v21 }
 0x915   : > { %2651 = vmatmul.mubr.msk.bf16.vlgmr.msra.gmra.mrb[32].mxu0 %vm875_vm3, %v1589_v8 }
 0x916   : > { %2662 = vmatprep.mubr.msk.bf16.mxu0 %vm2835_vm2, %v2834_v21 }
 0x9dc   : > { %v1484_v9 = vpop.f32.mrb[16].mxu1 }
 0x9dd   : > { %v2634_v10 = vpop.f32.mrb[17].mxu1 }
 0x9de   : > { %v1487_v11 = vpop.f32.mrb[18].mxu1 }
 0x9df   : > { %v2635_v12 = vpop.f32.mrb[19].mxu1 }
 0x9e0   : > { %v1532_v13 = vpop.f32.mrb[28].mxu0 }
 0x9e1   : > { %v2742_v14 = vpack.i.bf16 %v1532_v13, %v1484_v9  ;;  %v2640_v15 = vpop.f32.mrb[29].mxu0 }
 0x9e2   : > { %v1535_v16 = vpop.f32.mrb[30].mxu0 }
 0x9e3   : > { %v2641_v18 = vpop.f32.mrb[31].mxu0 }
 0x9e6   : > { %v1582_v19 = vpop.f32.mrb[20].mxu1 }
 0x9e7   : > { %v1638_v20 = vmul.f32 0.35355338, %v1582_v19  ;;  %v2646_v24 = vpop.f32.mrb[21].mxu1 }
 0x9e8   : > { %v1585_v25 = vpop.f32.mrb[22].mxu1  ;;  %v1632_v26 = vpop.f32.mrb[32].mxu0 }
 0x9e9   : > { %v1639_v27 = vmul.f32 0.35355338, %v1632_v26  ;;  %v2647_v28 = vpop.f32.mrb[23].mxu1  ;;  %v2652_v30 = vpop.f32.mrb[33].mxu0  ;;  %v1640_v31 = vsel %vm875_vm3, %v1638_v20, -inf }
 0x9ea   : > { %1641 = vmax.xlane.f32.xlu0 %v1640_v31  ;;  %v1635_v32 = vpop.f32.mrb[34].mxu0 }
 0x9eb   : > { %v2653_v34 = vpop.f32.mrb[35].mxu0  ;;  %v1643_v35 = vsel %vm875_vm3, %v1639_v27, -inf }
 0x9ec   : > { %1644 = vmax.xlane.f32.xlu1 %v1643_v35 }
 0x9fd   : > { %1712 = vrot.lane.b32.xlu1 %v3067_v44, %s2846_s27 }
 0xa01   : > { %2738 = vrot.lane.b32.xlu1 %v2737_v23, %s2847_s28 }
 0xa05   : > { %2743 = vrot.lane.b32.xlu1 %v2742_v14, %s2848_s29 }
 0xa77   : > { %v1642_v36 = vpop.xlane.xlu0 %1641 }
 0xa78   : > { %v1646_v37 = vsub.f32 %v1638_v20, %v1642_v36 }
 0xa79   : > { %v1645_v38 = vpop.xlane.xlu1 %1644 }
 0xa7a   : > { %v1648_v39 = vmul.f32 1.442695, %v1646_v37  ;;  %v1647_v40 = vsub.f32 %v1639_v27, %v1645_v38 }
 0xa7c   : > { %2794 = vpow2.f32 %v1648_v39  ;;  %v1650_v42 = vmul.f32 1.442695, %v1647_v40 }
 0xa7d   : > { %v1713_v43 = vpop.permute.xlu1 %1712 }
 0xa7e   : > { %2796 = vpow2.f32 %v1650_v42  ;;  %v1718_v45 = vsel %vm1002_vm4, %v1713_v43, 0 }
 0xa7f   : > { %2661 = vmatpush3.bf16.msra.mxu0 %v1718_v45  ;;  %v2756_v45 = vld [vmem:[%s3004_s0] sm:$0xff]  }
 0xa80   : > { %2674 = vmatprep.subr.bf16.mxu0 %v2834_v21 }
 0xa81   : > { %v2739_v2 = vpop.permute.xlu1 %2738 }
 0xa82   : > { %v2741_v4 = vunpack.i.h.bf16 %v2739_v2  ;;  %v2740_v5 = vunpack.i.l.bf16 %v2739_v2  ;;  %v2765_v2 = vld [vmem:[%s3018_s24 + $0x38] sm:$0xff]  }
 0xa84   : > { %v1785_v11 = vsel %vm875_vm3, %v3115_v33, %v2741_v4  ;;  %v1784_v12 = vsel %vm875_vm3, %v3113_v29, %v2740_v5  ;;  %v2475_v33 = vld [vmem:[%s3354_s5] ss:$0 sm:$0xff] }
 0xa85   : > { %v2744_v3 = vpop.permute.xlu1 %2743 }
 0xa86   : > { %v2795_v44 = vpop.eup %2794  ;;  %v2746_v8 = vunpack.i.h.bf16 %v2744_v3  ;;  %v2745_v9 = vunpack.i.l.bf16 %v2744_v3  ;;  %v2481_v3 = vld [vmem:[%s739_s4] ss:$0 sm:$0xff] }
 0xa87   : > { %v1652_v17 = vsel %vm875_vm3, %v2795_v44, 0.0 }
 0xa88   : > { %v2797_v22 = vpop.eup %2796  ;;  %1653 = vadd.xlane.f32.xlu0 %v1652_v17  ;;  %v1787_v15 = vsel %vm1786_vm5, %v1784_v12, %v2745_v9  ;;  %v1788_v16 = vsel %vm1786_vm5, %v1785_v11, %v2746_v8  ;;  %v2758_v17 = vld [vmem:[%s3018_s24] sm:$0xff]  }
 0xa89   : > { %v1655_v23 = vsel %vm875_vm3, %v2797_v22, 0.0 }
 0xa8c   : > { %1656 = vadd.xlane.f32.xlu0 %v1655_v23 }
 0xaa2   : > { %1664 = vrot.lane.b32.xlu0 %v3065_v41, %s2846_s27 }
 0xb15   : > { %v1654_v46 = vpop.xlane.xlu0 %1653 }
 0xb16   : > { %2798 = vrcp.f32 %v1654_v46 }
 0xb19   : > { %v1657_v47 = vpop.xlane.xlu0 %1656 }
 0xb1a   : > { %2800 = vrcp.f32 %v1657_v47 }
 0xb1d   : > { %v1665_v48 = vpop.permute.xlu0 %1664 }
 0xb1e   : > { %v1670_v49 = vsel %vm1002_vm4, %v1665_v48, 0 }
 0xb1f   : > { %2655 = vmatpush3.bf16.msra.mxu1 %v1670_v49 }
 0xb20   : > { %v2799_v50 = vpop.eup %2798  ;;  %2666 = vmatprep.subr.bf16.mxu1 %v2834_v21 }
 0xb21   : > { %v1660_v51 = vmul.f32 %v2799_v50, %v2795_v44  ;;  %v2757_v44 = vld [vmem:[%s3004_s0 + $0x8] sm:$0xff]  }
 0xb23   : > { %v1662_v52 = vpack.c.bf16 %v1660_v51, %v1660_v51 }
 0xb24   : > { %v2801_v53 = vpop.eup %2800 }
 0xb25   : > { %v1661_v54 = vmul.f32 %v2801_v53, %v2797_v22  ;;  %2657 = vmatmul.mubr.msk.bf16.vlgmr.msra.gmra.mrb[24].mxu1 %vm875_vm3, %v1662_v52  ;;  %v2759_v22 = vld [vmem:[%s3018_s24 + $0x8] sm:$0xff]   ;;  %v2479_v53 = vld [vmem:[%s3355_s19] ss:$0 sm:$0xff]  ;;  %s3357_s19 = sld [smem:[#allocation12_spill]] (!%p2494_p5) }
 0xb26   : > { %2670 = vmatprep.mubr.msk.bf16.mxu1 %vm2835_vm2, %v2834_v21  ;;  %2667 = vmatpush3.bf16.msra.mxu1 %v2754_v55 }
 0xb27   : > { %v1663_v41 = vpack.c.bf16 %v1661_v54, %v1661_v54  ;;  %2668 = vmatprep.subr.bf16.mxu1 %v2834_v21 }
 0xb29   : > { %2663 = vmatmul.mubr.msk.bf16.vlgmr.msra.gmra.mrb[36].mxu0 %vm875_vm3, %v1663_v41 }
 0xb2a   : > { %2678 = vmatprep.mubr.msk.bf16.mxu0 %vm2835_vm2, %v2834_v21  ;;  %2669 = vmatpush3.bf16.msra.mxu1 %v2755_v56  ;;  %v2480_v56 = vld [vmem:[%s731_s26] ss:$0 sm:$0xff]  ;;  %s3358_s26 = sld [smem:[#allocation13_spill]] (!%p2494_p5) }
 0xb2b   : > { %2682 = vmatprep.subr.bf16.mxu1 %v2834_v21  ;;  %2675 = vmatpush3.bf16.msra.mxu0 %v2756_v45 }
 0xb2c   : > { %2676 = vmatprep.subr.bf16.mxu0 %v2834_v21 }
 0xb2f   : > { %2677 = vmatpush3.bf16.msra.mxu0 %v2757_v44 }
 0xbf8   : > { %v1706_v57 = vpop.f32.mrb[24].mxu1 }
 0xbf9   : > { %v2658_v58 = vpop.f32.mrb[25].mxu1 }
 0xbfa   : > { %v1709_v59 = vpop.f32.mrb[26].mxu1 }
 0xbfb   : > { %v2659_v60 = vpop.f32.mrb[27].mxu1 }
 0xbfc   : > { %v1754_v61 = vpop.f32.mrb[36].mxu0 }
 0xbfd   : > { %v2747_v62 = vpack.i.bf16 %v1754_v61, %v1706_v57  ;;  %v2664_v63 = vpop.f32.mrb[37].mxu0  ;;  %v2760_v61 = vld [vmem:[%s3018_s24 + $0x10] sm:$0xff]  }
 0xbfe   : > { %v1757_v0 = vpop.f32.mrb[38].mxu0  ;;  %v2762_v63 = vld [vmem:[%s3018_s24 + $0x20] sm:$0xff]  }
 0xbff   : > { %2748 = vrot.lane.b32.xlu0 %v2747_v62, %s2849_s30  ;;  %v2665_v1 = vpop.f32.mrb[39].mxu0  ;;  %v2761_v62 = vld [vmem:[%s3018_s24 + $0x18] sm:$0xff]   ;;  %v2763_v0 = vld [vmem:[%s3018_s24 + $0x28] sm:$0xff]  }
 0xc00   : > { %v2764_v1 = vld [vmem:[%s3018_s24 + $0x30] sm:$0xff]  }
 0xc71   : > { %v2749_v10 = vpop.permute.xlu0 %2748 }
 0xc72   : > { %v2751_v13 = vunpack.i.h.bf16 %v2749_v10  ;;  %v2750_v14 = vunpack.i.l.bf16 %v2749_v10 }
 0xc74   : > { %v1791_v18 = vsel %vm1789_vm6, %v1788_v16, %v2751_v13  ;;  %v1790_v19 = vsel %vm1789_vm6, %v1787_v15, %v2750_v14 }
 0xc75   : > { %v1796_v20 = vpack.c.bf16 %v1791_v18, %v1790_v19 }
 0xc77   : > { %2671 = vmatmul.mubr.msk.bf16.vlgmr.msra.gmra.mrb[28].mxu1 %vm765_vm1, %v1796_v20 }
 0xc78   : > { %2698 = vmatprep.mubr.msk.bf16.mxu1 %vm2835_vm2, %v2834_v21  ;;  %2683 = vmatpush3.bf16.msra.mxu1 %v2758_v17 }
 0xc79   : > { %2684 = vmatprep.subr.bf16.mxu1 %v2834_v21 }
 0xc7c   : > { %2685 = vmatpush3.bf16.msra.mxu1 %v2759_v22 }
 0xc7d   : > { %2686 = vmatprep.subr.bf16.mxu1 %v2834_v21 }
 0xc80   : > { %2687 = vmatpush3.bf16.msra.mxu1 %v2760_v61 }
 0xc81   : > { %2688 = vmatprep.subr.bf16.mxu1 %v2834_v21 }
 0xc84   : > { %2689 = vmatpush3.bf16.msra.mxu1 %v2761_v62 }
 0xc85   : > { %2690 = vmatprep.subr.bf16.mxu1 %v2834_v21 }
 0xc88   : > { %2691 = vmatpush3.bf16.msra.mxu1 %v2762_v63  ;;  %v2850_v63 = vmov (!%p2494_p5), 0  }
 0xc89   : > { %2692 = vmatprep.subr.bf16.mxu1 %v2834_v21  ;;  %2810 = vset.pattern.permute.xlu0 (!%p2494_p5), %v2850_v63 }
 0xc8a   : > { %2811 = vset.pattern.permute.xlu1 (!%p2494_p5), %v2850_v63 }
 0xc8c   : > { %2693 = vmatpush3.bf16.msra.mxu1 %v2763_v0  ;;  %v2498_v0 = vld [vmem:[#allocation3] ss:$0 sm:$0xff] (!%p2494_p5) }
 0xc8d   : > { %2694 = vmatprep.subr.bf16.mxu1 %v2834_v21 }
 0xc90   : > { %2695 = vmatpush3.bf16.msra.mxu1 %v2764_v1 }
 0xc91   : > { %2696 = vmatprep.subr.bf16.mxu1 %v2834_v21 }
 0xc94   : > { %2697 = vmatpush3.bf16.msra.mxu1 %v2765_v2 }
 0xd4a   : > { %v1853_v24 = vpop.f32.mrb[28].mxu1 }
 0xd4b   : > { %v1854_v25 = vadd.f32 %v2475_v33, %v1853_v24  ;;  %v2672_v29 = vpop.f32.mrb[29].mxu1 }
 0xd4c   : > { %v1856_v26 = vpop.f32.mrb[30].mxu1 }
 0xd4d   : > { %v1857_v27 = vadd.f32 %v2475_v33, %v1856_v26  ;;  %v2673_v28 = vpop.f32.mrb[31].mxu1  ;;  %v1860_v30 = vadd.f32 %v1854_v25, %v3030_v6  ;;  %v2485_v25 = vld [vmem:[%s747_s17] ss:$0 sm:$0xff] }
 0xd4f   : > { %v1864_v31 = vsel %vm765_vm1, %v1860_v30, 0.0  ;;  %v1861_v32 = vadd.f32 %v1857_v27, %v3032_v7 }
 0xd50   : > { %1865 = vadd.xlane.f32.xlu1 %v1864_v31 }
 0xd51   : > { %v1867_v34 = vsel %vm765_vm1, %v1861_v32, 0.0 }
 0xd52   : > { %1868 = vadd.xlane.f32.xlu0 %v1867_v34 }
 0xddd   : > { %v1866_v35 = vpop.xlane.xlu1 %1865 }
 0xdde   : > { %v1870_v36 = vmul.f32 0.03125, %v1866_v35 }
 0xddf   : > { %v1869_v37 = vpop.xlane.xlu0 %1868 }
 0xde0   : > { %v1872_v38 = vsub.f32 %v1860_v30, %v1870_v36  ;;  %v1871_v39 = vmul.f32 0.03125, %v1869_v37 }
 0xde2   : > { %v1873_v40 = vsub.f32 %v1861_v32, %v1871_v39  ;;  %v1874_v42 = vmul.f32 %v1872_v38, %v1872_v38 }
 0xde4   : > { %v1876_v6 = vsel %vm765_vm1, %v1874_v42, 0.0  ;;  %v1875_v43 = vmul.f32 %v1873_v40, %v1873_v40 }
 0xde5   : > { %1877 = vadd.xlane.f32.xlu0 %v1876_v6 }
 0xde6   : > { %v1879_v7 = vsel %vm765_vm1, %v1875_v43, 0.0 }
 0xde9   : > { %1880 = vadd.xlane.f32.xlu0 %v1879_v7 }
 0xe72   : > { %v1878_v23 = vpop.xlane.xlu0 %1877 }
 0xe73   : > { %v1882_v46 = vmul.f32 0.03125, %v1878_v23 }
 0xe75   : > { %v1884_v47 = vadd.f32 1e-05, %v1882_v46 }
 0xe76   : > { %v1881_v48 = vpop.xlane.xlu0 %1880 }
 0xe77   : > { %2802 = vrsqrt.f32 %v1884_v47  ;;  %v1883_v49 = vmul.f32 0.03125, %v1881_v48 }
 0xe79   : > { %v1885_v50 = vadd.f32 1e-05, %v1883_v49 }
 0xe7b   : > { %2804 = vrsqrt.f32 %v1885_v50  ;;  %v2495_v50 = vld [vmem:[%s3324_s13] ss:$0 sm:$0xff] (!%p2494_p5) }
 0xe81   : > { %v2803_v51 = vpop.eup %2802 }
 0xe82   : > { %v1888_v52 = vmul.f32 %v2803_v51, %v1872_v38 }
 0xe84   : > { %v1896_v41 = vmul.f32 %v2479_v53, %v1888_v52  ;;  %v2496_v52 = vld [vmem:[%s3325_s14] ss:$0 sm:$0xff] (!%p2494_p5) }
 0xe85   : > { %v2805_v54 = vpop.eup %2804 }
 0xe86   : > { %v1889_v55 = vmul.f32 %v2805_v54, %v1873_v40  ;;  %v1904_v58 = vadd.f32 %v2480_v56, %v1896_v41  ;;  %v2497_v41 = vld [vmem:[%s3326_s15] ss:$0 sm:$0xff] (!%p2494_p5) }
 0xe88   : > { %v1897_v57 = vmul.f32 %v2479_v53, %v1889_v55 }
 0xe8a   : > { %v1905_v59 = vadd.f32 %v2480_v56, %v1897_v57 }
 0xe8c   : > { %v1910_v60 = vpack.c.bf16 %v1905_v59, %v1904_v58 }
 0xe8e   : > { %2679 = vmatmul.mubr.msk.bf16.vlgmr.msra.gmra.mrb[40].mxu0 %vm765_vm1, %v1910_v60 }
 0xf61   : > { %v1967_v4 = vpop.f32.mrb[40].mxu0 }
 0xf62   : > { %v1968_v5 = vadd.f32 %v2481_v3, %v1967_v4  ;;  %v2680_v8 = vpop.f32.mrb[41].mxu0 }
 0xf63   : > { %v1970_v9 = vpop.f32.mrb[42].mxu0 }
 0xf64   : > { %v1976_v10 = vmul.f32 0.70710677, %v1968_v5  ;;  %v1971_v11 = vadd.f32 %v2481_v3, %v1970_v9  ;;  %v2681_v12 = vpop.f32.mrb[43].mxu0  ;;  %v1974_v16 = vmul.f32 0.5, %v1968_v5 }
 0xf66   : > { %2806 = verf.f32 %v1976_v10  ;;  %v1977_v13 = vmul.f32 0.70710677, %v1971_v11  ;;  %v1975_v18 = vmul.f32 0.5, %v1971_v11 }
 0xf68   : > { %2808 = verf.f32 %v1977_v13 }
 0xf70   : > { %v2807_v14 = vpop.eup %2806 }
 0xf71   : > { %v1980_v21 = vadd.f32 1.0, %v2807_v14 }
 0xf72   : > { %v2809_v15 = vpop.eup %2808 }
 0xf73   : > { %v1981_v19 = vadd.f32 1.0, %v2809_v15  ;;  %v1982_v20 = vmul.f32 %v1980_v21, %v1974_v16 }
 0xf75   : > { %v1983_v33 = vmul.f32 %v1981_v19, %v1975_v18 }
 0xf77   : > { %v2000_v24 = vpack.c.bf16 %v1983_v33, %v1982_v20 }
 0xf79   : > { %2699 = vmatmul.mubr.bf16.vlgmr.msra.gmra.mrb[32].mxu1 %v2000_v24 }
0x104c   : > { %v2090_v29 = vpop.f32.mrb[32].mxu1 }
0x104d   : > { %v2091_v26 = vadd.f32 %v2485_v25, %v2090_v29  ;;  %v2700_v27 = vpop.f32.mrb[33].mxu1  ;;  %2104 = sbr.rel (%p2494_p5) target bundleno = 5060 (0x13c4), region = 104 }
0x104e   : > { %v2093_v28 = vpop.f32.mrb[34].mxu1 }
0x104f   : > { %v2097_v30 = vadd.f32 %v2091_v26, %v1904_v58  ;;  %v2094_v31 = vadd.f32 %v2485_v25, %v2093_v28  ;;  %v2701_v32 = vpop.f32.mrb[35].mxu1 }
0x1051   : > { %2099 = vst.msk [vmem:[#allocation2] sm:$0xff] %vm765_vm1, %v2097_v30  ;;  %v2098_v34 = vadd.f32 %v2094_v31, %v1905_v59  ;;  %v2107_v35 = vsel (!%p2494_p5), %vm765_vm1, %v2097_v30, 0.0 }
0x1052   : > { %2108 = vadd.xlane.f32.xlu0 (!%p2494_p5), %v2107_v35 }
0x1053   : > { %2100 = vst.msk [vmem:[#allocation2 + $0x8] sm:$0xff] %vm765_vm1, %v2098_v34  ;;  %v2110_v36 = vsel (!%p2494_p5), %vm765_vm1, %v2098_v34, 0.0 }
0x1056   : > { %2111 = vadd.xlane.f32.xlu0 %v2110_v36 }
0x10df   : > { %v2109_v37 = vpop.xlane.xlu0 %2108 }
0x10e0   : > { %v2113_v38 = vmul.f32 0.03125, %v2109_v37 }
0x10e2   : > { %v2115_v39 = vsub.f32 %v2097_v30, %v2113_v38 }
0x10e3   : > { %v2112_v40 = vpop.xlane.xlu0 %2111 }
0x10e4   : > { %v2114_v42 = vmul.f32 0.03125, %v2112_v40  ;;  %v2117_v6 = vmul.f32 %v2115_v39, %v2115_v39 }
0x10e6   : > { %v2116_v43 = vsub.f32 %v2098_v34, %v2114_v42  ;;  %v2119_v7 = vsel %vm765_vm1, %v2117_v6, 0.0 }
0x10e7   : > { %2120 = vadd.xlane.f32.xlu1 %v2119_v7 }
0x10e8   : > { %v2118_v45 = vmul.f32 %v2116_v43, %v2116_v43 }
0x10ea   : > { %v2122_v44 = vsel %vm765_vm1, %v2118_v45, 0.0 }
0x10eb   : > { %2123 = vadd.xlane.f32.xlu1 %v2122_v44 }
0x1174   : > { %v2121_v17 = vpop.xlane.xlu1 %2120 }
0x1175   : > { %v2125_v22 = vmul.f32 0.03125, %v2121_v17 }
0x1177   : > { %v2127_v23 = vadd.f32 1e-05, %v2125_v22  ;;  %v2812_v22 = vld [vmem:[%s3356_s18] sm:$0xff]  }
0x1178   : > { %v2124_v46 = vpop.xlane.xlu1 %2123 }
0x1179   : > { %2814 = vrsqrt.f32 %v2127_v23  ;;  %v2126_v47 = vmul.f32 0.03125, %v2124_v46  ;;  %v2851_v23 = vmov 0.0   ;;  %v2813_v46 = vld [vmem:[%s3356_s18 + $0x8] sm:$0xff]  }
0x117a   : > { %2702 = vmatprep.subr.bf16.mxu0 %v2851_v23  ;;  %2706 = vmatprep.mubr.msk.bf16.mxu0 %vm2852_vm8, %v2851_v23 }
0x117b   : > { %v2128_v48 = vadd.f32 1e-05, %v2126_v47  ;;  %2703 = vmatpush3.bf16.msra.mxu0 %v2812_v22 }
0x117c   : > { %2704 = vmatprep.subr.bf16.mxu0 %v2851_v23 }
0x117d   : > { %2816 = vrsqrt.f32 %v2128_v48 }
0x117f   : > { %2705 = vmatpush3.bf16.msra.mxu0 %v2813_v46 }
0x1183   : > { %v2815_v49 = vpop.eup %2814 }
0x1184   : > { %v2131_v51 = vmul.f32 %v2815_v49, %v2115_v39 }
0x1186   : > { %v2139_v53 = vmul.f32 %v2495_v50, %v2131_v51 }
0x1187   : > { %v2817_v54 = vpop.eup %2816 }
0x1188   : > { %v3279_v55 = vadd.f32 %v2496_v52, %v2139_v53  ;;  %v2132_v56 = vmul.f32 %v2817_v54, %v2116_v43 }
0x118a   : > { %v2156_v57 = vmul.f32 %v2497_v41, %v3279_v55  ;;  %v2140_v58 = vmul.f32 %v2495_v50, %v2132_v56 }
0x118c   : > { %v2158_v59 = vsel %vm765_vm1, %v2156_v57, 0.0  ;;  %v3283_v60 = vadd.f32 %v2496_v52, %v2140_v58 }
0x118d   : > { %2159 = vadd.xlane.f32.xlu0 %v2158_v59 }
0x118e   : > { %v2157_v61 = vmul.f32 %v2497_v41, %v3283_v60 }
0x1190   : > { %v2161_v62 = vsel %vm765_vm1, %v2157_v61, 0.0 }
0x1191   : > { %2162 = vadd.xlane.f32.xlu1 %v2161_v62 }
0x121a   : > { %v2160_v1 = vpop.xlane.xlu0 %2159 }
0x121b   : > { %v2171_v2 = vadd.f32 %v2498_v0, %v2160_v1 }
0x121d   : > { %v2174_v3 = vsel %vm2173_vm7, %v2171_v2, -inf }
0x121e   : > { %v2175_v4 = vrot.slane %v2174_v3, 4  ;;  %v2163_v5 = vpop.xlane.xlu1 %2162 }
0x121f   : > { %v2172_v8 = vadd.f32 %v2498_v0, %v2163_v5 }
0x1220   : > { %v2176_v9 = vmax.f32 %v2174_v3, %v2175_v4 }
0x1221   : > { %v2181_v10 = vsel %vm2173_vm7, %v2172_v8, -inf }
0x1222   : > { %v2177_v11 = vrot.slane %v2176_v9, 2  ;;  %v2182_v12 = vrot.slane %v2181_v10, 4 }
0x1224   : > { %v2178_v13 = vmax.f32 %v2176_v9, %v2177_v11  ;;  %v2183_v14 = vmax.f32 %v2181_v10, %v2182_v12 }
0x1226   : > { %v2179_v21 = vrot.slane %v2178_v13, 1  ;;  %v2184_v15 = vrot.slane %v2183_v14, 2 }
0x1228   : > { %v2180_v16 = vmax.f32 %v2178_v13, %v2179_v21  ;;  %v2185_v18 = vmax.f32 %v2183_v14, %v2184_v15 }
0x122a   : > { %v2188_v19 = vsub.f32 %v2171_v2, %v2180_v16  ;;  %v2186_v20 = vrot.slane %v2185_v18, 1 }
0x122c   : > { %v2190_v33 = vmul.f32 1.442695, %v2188_v19  ;;  %v2187_v24 = vmax.f32 %v2185_v18, %v2186_v20 }
0x122e   : > { %2818 = vpow2.f32 %v2190_v33  ;;  %v2189_v25 = vsub.f32 %v2172_v8, %v2187_v24  ;;  %v2499_v8 = vld [vmem:[%s3357_s19] ss:$0 sm:$0xff] }
0x1230   : > { %v2192_v29 = vmul.f32 1.442695, %v2189_v25 }
0x1232   : > { %2820 = vpow2.f32 %v2192_v29 }
0x1238   : > { %v2819_v26 = vpop.eup %2818 }
0x1239   : > { %v2194_v27 = vsel %vm2173_vm7, %v2819_v26, 0.0 }
0x123a   : > { %v2195_v28 = vrot.slane %v2194_v27, 4 }
0x123c   : > { %v2821_v30 = vpop.eup %2820  ;;  %v2196_v31 = vadd.f32 %v2195_v28, %v2194_v27 }
0x123d   : > { %v2201_v32 = vsel %vm2173_vm7, %v2821_v30, 0.0 }
0x123e   : > { %v2197_v34 = vrot.slane %v2196_v31, 2  ;;  %v2202_v35 = vrot.slane %v2201_v32, 4 }
0x1240   : > { %v2198_v36 = vadd.f32 %v2197_v34, %v2196_v31  ;;  %v2203_v37 = vadd.f32 %v2202_v35, %v2201_v32 }
0x1242   : > { %v2199_v38 = vrot.slane %v2198_v36, 1  ;;  %v2204_v39 = vrot.slane %v2203_v37, 2 }
0x1244   : > { %v2200_v40 = vadd.f32 %v2199_v38, %v2198_v36  ;;  %v2205_v42 = vadd.f32 %v2204_v39, %v2203_v37 }
0x1246   : > { %2822 = vrcp.f32 %v2200_v40  ;;  %v2206_v6 = vrot.slane %v2205_v42, 1 }
0x1248   : > { %v2207_v43 = vadd.f32 %v2206_v6, %v2205_v42 }
0x124a   : > { %2824 = vrcp.f32 %v2207_v43 }
0x1250   : > { %v2823_v7 = vpop.eup %2822 }
0x1251   : > { %v2210_v45 = vmul.f32 %v2823_v7, %v2819_v26 }
0x1253   : > { %2214 = vperm.xlu0 %2810, %v2210_v45  }
0x1254   : > { %v2825_v44 = vpop.eup %2824 }
0x1255   : > { %v2211_v17 = vmul.f32 %v2825_v44, %v2821_v30 }
0x1257   : > { %2219 = vperm.xlu1 %2811, %v2211_v17  }
0x12d2   : > { %v2215_v47 = vpop.permute.xlu0 %2214 }
0x12d3   : > { %v2222_v48 = vmul.f32 %v2215_v47, %v3279_v55 }
0x12d5   : > { %v2224_v49 = vsel %vm765_vm1, %v2222_v48, 0.0 }
0x12d6   : > { %v2225_v50 = vrot.slane %v2224_v49, 4  ;;  %v2220_v51 = vpop.permute.xlu1 %2219 }
0x12d7   : > { %v2223_v52 = vmul.f32 %v2220_v51, %v3283_v60 }
0x12d8   : > { %v2226_v53 = vadd.f32 %v2225_v50, %v2224_v49 }
0x12d9   : > { %v2231_v54 = vsel %vm765_vm1, %v2223_v52, 0.0 }
0x12da   : > { %v2227_v41 = vrot.slane %v2226_v53, 2  ;;  %v2232_v56 = vrot.slane %v2231_v54, 4 }
0x12dc   : > { %v2228_v57 = vadd.f32 %v2227_v41, %v2226_v53  ;;  %v2233_v58 = vadd.f32 %v2232_v56, %v2231_v54 }
0x12de   : > { %v2229_v59 = vrot.slane %v2228_v57, 1  ;;  %v2234_v61 = vrot.slane %v2233_v58, 2 }
0x12e0   : > { %v2230_v62 = vadd.f32 %v2229_v59, %v2228_v57  ;;  %v2235_v63 = vadd.f32 %v2234_v61, %v2233_v58 }
0x12e2   : > { %v2236_v0 = vrot.slane %v2235_v63, 1  ;;  %v2242_v1 = vpack.c.bf16 %v2230_v62, %v2230_v62 }
0x12e4   : > { %v2237_v55 = vadd.f32 %v2236_v0, %v2235_v63  ;;  %v2253_v3 = vunpack.c.l.b16 %v2242_v1 }
0x12e6   : > { %v2243_v2 = vpack.c.bf16 %v2237_v55, %v2237_v55 }
0x12e8   : > { %v2254_v4 = vunpack.c.l.b16 %v2243_v2 }
0x12ea   : > { %v2256_v5 = vsel %vm2255_vm9, %v2254_v4, %v2253_v3 }
0x12eb   : > { %v2257_v60 = vpack.c.b16 %v2256_v5, %v2256_v5 }
0x12ed   : > { %2707 = vmatmul.mubr.msk.bf16.vlgmr.msra.gmra.mrb[0].mxu0 %vm765_vm1, %v2257_v60 }
0x13c0   : > { %v2307_v9 = vpop.f32.mrb[0].mxu0 }
0x13c1   : > { %v2308_v10 = vadd.f32 %v2499_v8, %v2307_v9  ;;  %v2708_v11 = vpop.f32.mrb[1].mxu0 }
0x13c2   : > { %v2310_v12 = vpop.f32.mrb[2].mxu0 }
0x13c3   : > { %2313 = vst [vmem:[%s3358_s26] sm:$0x3] %v2308_v10  ;;  %v2709_v13 = vpop.f32.mrb[3].mxu0 }
0x13c4 PF: > { %s3359_s2 = sld [smem:[#allocation4_spill]] }
0x13ca   : > { %s31_s20 = sadd.s32 1, %s3359_s2  }
0x13cb   : > { %p28_p6 = scmp.ge.s32.totalorder %s31_s20, 4  }
0x13cd   :  { %30 = sbr.rel (!%p28_p6) target bundleno = 10 (0xa), region = 160 }

</bundles_post_ra>
